<compile_context>
chip_gen: v7x
topology: tpu7x:2x2x1
jax: 0.10.0
libtpu: 0.0.40
codegen_flags: <defaults>
</compile_context>

<pallas_src>
import functools

import jax
import jax.numpy as jnp
from jax import lax
from jax.experimental import pallas as pl
from jax.experimental.pallas import tpu as pltpu

EPS = 1e-5


def _fused_block_kernel(x_ref, w1_ref, b1_ref, w2_ref, b2_ref, out_ref, *, H, W):
    """(conv3x3 + folded BN/FiLM bias + ReLU) x2 + identity residual.

    x_ref  : (nb, C, S) f32   nb images, planes flattened to S = H*W lanes
    w*_ref : (9, Co, Ci) f32  folded conv weights, one (Co, Ci) matrix per tap
    b*_ref : (Co, 1)     f32  folded BN+FiLM bias
    out_ref: (nb, Co, S)
    """
    nb, C, S = x_ref.shape
    small_c = C <= 8                     # VPU-FMA path for tiny channel counts

    # ---- halo validity masks, built in-kernel (review: no mask DMA) --------
    col = lax.broadcasted_iota(jnp.int32, (1, S), 1)          # flat pixel id
    if W & (W - 1) == 0:
        w_idx = jnp.bitwise_and(col, W - 1)                   # col % W (pow2 W)
    else:
        w_idx = col - (col // W) * W   # TODO(synk): relies on vector int div
    row_ok = {-1: col >= W, 0: None, 1: col < (H - 1) * W}
    col_ok = {-1: w_idx >= 1, 0: None, 1: w_idx < (W - 1)}
    masks = []
    for t in range(9):
        dh, dw = t // 3 - 1, t % 3 - 1
        m = row_ok[dh]
        if col_ok[dw] is not None:
            m = col_ok[dw] if m is None else jnp.logical_and(m, col_ok[dw])
        masks.append(m)                   # None => centre / always-valid tap

    def load_weights(w_ref):
        if small_c:
            # Per-tap, per-input-channel (Co, 1) columns, loaded once.
            return [[w_ref[t][:, ci:ci + 1] for ci in range(C)]
                    for t in range(9)]
        return [w_ref[t] for t in range(9)]

    def conv3x3(plane, w_taps):
        # 9 taps: lane roll (XLU) + masked select (VPU) + channel contraction,
        # value-chained so partials never round-trip through VMEM.
        acc = None
        for t in range(9):
            dh, dw = t // 3 - 1, t % 3 - 1
            d = dh * W + dw                     # flat lane offset of the tap
            tap = plane if d == 0 else pltpu.roll(plane, (-d) % S, 1)
            if masks[t] is not None:
                tap = jnp.where(masks[t], tap, 0.0)
            if small_c:
                # (Co,1) * (1,S) broadcast FMAs on the VPU (MXU <1% utilised
                # at C=4, so we keep it off the critical path entirely).
                for ci in range(C):
                    term = w_taps[t][ci] * tap[ci:ci + 1, :]
                    acc = term if acc is None else acc + term
            else:
                # Larger C: small MXU dot per tap.  (For C >= 32 one would
                # additionally stack the 9 taps along K into one
                # (Co, 9*Ci) x (9*Ci, S) dot and use bf16 operands.)
                part = jnp.dot(w_taps[t], tap,
                               preferred_element_type=jnp.float32)
                acc = part if acc is None else acc + part
        return acc

    w1_taps = load_weights(w1_ref)
    w2_taps = load_weights(w2_ref)
    b1 = b1_ref[...]                     # (Co, 1), broadcast over lanes
    b2 = b2_ref[...]

    for b in range(nb):                  # images batched per grid step
        x_cs = x_ref[b].astype(jnp.float32)          # loaded exactly once
        y1 = jnp.maximum(conv3x3(x_cs, w1_taps) + b1, 0.0)
        y2 = conv3x3(y1, w2_taps) + b2 + x_cs        # identity residual
        out_ref[b] = jnp.maximum(y2, 0.0).astype(out_ref.dtype)


def _fold_bn_film(w, mean, var, bn_w, bn_b, gamma, beta):
    """Fold inference-mode BatchNorm + FiLM into conv weights and a bias."""
    inv = lax.rsqrt(var + EPS)
    scale = gamma * bn_w * inv                           # (Co,)
    bias = gamma * (bn_b - mean * bn_w * inv) + beta     # (Co,)
    kh, kw, ci, co = w.shape
    wf = (w * scale[None, None, None, :]).reshape(kh * kw, ci, co)
    wf = jnp.transpose(wf, (0, 2, 1))                    # (9, Co, Ci)
    return wf.astype(jnp.float32), bias.reshape(co, 1).astype(jnp.float32)


def _images_per_block(n, cap=8):
    """Largest divisor of n (<= cap) that still leaves >= 2 grid steps."""
    best = 1
    for nb in range(1, min(n, cap) + 1):
        if n % nb == 0 and n // nb >= 2:
            best = nb
    return best


def basic_block_film(x, gamma, beta, params):
    """FiLM ResNet basic block, stride=1, identity shortcut (inplanes==planes).

    x:     (N, C, H, W) NCHW (as in the PyTorch module)
    gamma: (2, C) multiplicative FiLM params (one row per conv layer)
    beta:  (2, C) additive FiLM params
    """
    # TODO(synk): bn_fn is unspecified in the reference; implemented as
    # BatchNorm2d in inference mode (running stats); step_num is ignored.
    N, C, H, W = x.shape
    Co = params['w1'].shape[3]
    assert C == Co, "identity shortcut requires inplanes == planes"
    S = H * W

    w1f, b1 = _fold_bn_film(params['w1'], params['m1'], params['v1'],
                            params['bw1'], params['bb1'], gamma[0], beta[0])
    w2f, b2 = _fold_bn_film(params['w2'], params['m2'], params['v2'],
                            params['bw2'], params['bb2'], gamma[1], beta[1])

    # Metadata-only reshape: NCHW -> (N, C, H*W); spatial goes on lanes.
    xflat = x.reshape(N, C, S)

    nb = _images_per_block(N)            # batch images per step, keep >=2 steps
    grid = (N // nb,)

    # Double-buffered x/out blocks + weights, with headroom (review item).
    blk_bytes = nb * C * S * x.dtype.itemsize
    vmem_limit = min(max(8 * blk_bytes + (2 << 20), 16 << 20), 64 << 20)

    kernel = functools.partial(_fused_block_kernel, H=H, W=W)

    out_flat = pl.pallas_call(
        kernel,
        grid=grid,
        in_specs=[
            pl.BlockSpec((nb, C, S), lambda n: (n, 0, 0)),
            pl.BlockSpec((9, Co, C), lambda n: (0, 0, 0)),
            pl.BlockSpec((Co, 1), lambda n: (0, 0)),
            pl.BlockSpec((9, Co, Co), lambda n: (0, 0, 0)),
            pl.BlockSpec((Co, 1), lambda n: (0, 0)),
        ],
        out_specs=pl.BlockSpec((nb, Co, S), lambda n: (n, 0, 0)),
        out_shape=jax.ShapeDtypeStruct((N, Co, S), x.dtype),
        compiler_params=pltpu.CompilerParams(
            dimension_semantics=("parallel",),
            vmem_limit_bytes=vmem_limit),
    )(xflat, w1f, b1, w2f, b2)

    # Metadata-only reshape back to NCHW (no post-kernel slice or copy).
    return out_flat.reshape(N, Co, H, W)


def _reference_block(x, gamma, beta, params):
    """Pure-JAX (f32, NCHW) reference for correctness checking."""
    def conv(h, w):
        return lax.conv_general_dilated(
            h, w, (1, 1), 'SAME', dimension_numbers=('NCHW', 'HWIO', 'NCHW'))

    def bn_film(h, m, v, bw, bb, g, b):
        m, v, bw, bb, g, b = (t[None, :, None, None]
                              for t in (m, v, bw, bb, g, b))
        h = (h - m) * lax.rsqrt(v + EPS) * bw + bb
        return g * h + b

    out = conv(x, params['w1'])
    out = bn_film(out, params['m1'], params['v1'], params['bw1'],
                  params['bb1'], gamma[0], beta[0])
    out = jnp.maximum(out, 0.0)
    out = conv(out, params['w2'])
    out = bn_film(out, params['m2'], params['v2'], params['bw2'],
                  params['bb2'], gamma[1], beta[1])
    return jnp.maximum(out + x, 0.0)


if __name__ == "__main__":
    key = jax.random.PRNGKey(0)
    N, H, W = 2, 16, 16
    inplanes = planes = 4   # identity shortcut requires inplanes == planes

    ks = jax.random.split(key, 12)
    x = jax.random.normal(ks[0], (N, inplanes, H, W), jnp.float32)
    gamma = 1.0 + 0.1 * jax.random.normal(ks[1], (2, planes), jnp.float32)
    beta = 0.1 * jax.random.normal(ks[2], (2, planes), jnp.float32)

    params = {
        # conv weights, HWIO, Kaiming-ish scaling
        'w1': jax.random.normal(ks[3], (3, 3, inplanes, planes), jnp.float32)
              * (2.0 / (9 * inplanes)) ** 0.5,
        'w2': jax.random.normal(ks[4], (3, 3, planes, planes), jnp.float32)
              * (2.0 / (9 * planes)) ** 0.5,
        # BN running stats + affine (deterministic synthetic init)
        'm1': 0.1 * jax.random.normal(ks[5], (planes,), jnp.float32),
        'v1': 1.0 + 0.1 * jax.random.uniform(ks[6], (planes,), jnp.float32),
        'bw1': 1.0 + 0.05 * jax.random.normal(ks[7], (planes,), jnp.float32),
        'bb1': 0.05 * jax.random.normal(ks[8], (planes,), jnp.float32),
        'm2': 0.1 * jax.random.normal(ks[9], (planes,), jnp.float32),
        'v2': 1.0 + 0.1 * jax.random.uniform(ks[10], (planes,), jnp.float32),
        'bw2': 1.0 + 0.05 * jax.random.normal(ks[11], (planes,), jnp.float32),
        'bb2': jnp.zeros((planes,), jnp.float32),
    }

    out = jax.block_until_ready(basic_block_film(x, gamma, beta, params))
    ref = jax.block_until_ready(_reference_block(x, gamma, beta, params))

    assert out.shape == (N, planes, H, W), out.shape
    err = float(jnp.max(jnp.abs(out - ref)))
    # Everything is f32 inside the kernel -> tight tolerance vs f32 reference.
    assert jnp.allclose(out, ref, rtol=1e-3, atol=1e-3), err
    print("KERNEL_OK")
</pallas_src>

<mosaic_0001>
module attributes {stable_mosaic.version = 11 : i64} {
  func.func @_fused_block_kernel(%arg0: i32, %arg1: memref<1x4x256xf32, #tpu.memory_space<vmem>>, %arg2: memref<9x4x4xf32, #tpu.memory_space<vmem>>, %arg3: memref<4x1xf32, #tpu.memory_space<vmem>>, %arg4: memref<9x4x4xf32, #tpu.memory_space<vmem>>, %arg5: memref<4x1xf32, #tpu.memory_space<vmem>>, %arg6: memref<1x4x256xf32, #tpu.memory_space<vmem>>) attributes {dimension_semantics = [#tpu.dimension_semantics<parallel>], iteration_bounds = array<i64: 2>, scalar_prefetch = 0 : i64, scratch_operands = 0 : i64, tpu.core_type = #tpu.core_type<tc>, window_params = [{transform_indices = @transform_0, window_bounds = array<i64: 1, 4, 256>}, {pipeline_mode = #tpu.pipeline_mode<synchronous>, transform_indices = @transform_1, window_bounds = array<i64: 9, 4, 4>}, {pipeline_mode = #tpu.pipeline_mode<synchronous>, transform_indices = @transform_2, window_bounds = array<i64: 4, 1>}, {pipeline_mode = #tpu.pipeline_mode<synchronous>, transform_indices = @transform_3, window_bounds = array<i64: 9, 4, 4>}, {pipeline_mode = #tpu.pipeline_mode<synchronous>, transform_indices = @transform_4, window_bounds = array<i64: 4, 1>}, {transform_indices = @transform_5, window_bounds = array<i64: 1, 4, 256>}]} {
    %0 = tpu.iota {dimensions = array<i32: 1>} : vector<1x256xi32>
    %c15_i32 = arith.constant 15 : i32
    %1 = vector.broadcast %c15_i32 : i32 to vector<1x256xi32>
    %2 = arith.andi %0, %1 : vector<1x256xi32>
    %c16_i32 = arith.constant 16 : i32
    %3 = vector.broadcast %c16_i32 : i32 to vector<1x256xi32>
    %4 = arith.cmpi sge, %0, %3 : vector<1x256xi32>
    %c240_i32 = arith.constant 240 : i32
    %5 = vector.broadcast %c240_i32 : i32 to vector<1x256xi32>
    %6 = arith.cmpi slt, %0, %5 : vector<1x256xi32>
    %c1_i32 = arith.constant 1 : i32
    %7 = vector.broadcast %c1_i32 : i32 to vector<1x256xi32>
    %8 = arith.cmpi sge, %2, %7 : vector<1x256xi32>
    %c15_i32_0 = arith.constant 15 : i32
    %9 = vector.broadcast %c15_i32_0 : i32 to vector<1x256xi32>
    %10 = arith.cmpi slt, %2, %9 : vector<1x256xi32>
    %11 = arith.andi %4, %8 : vector<1x256xi1>
    %12 = arith.andi %4, %10 : vector<1x256xi1>
    %13 = arith.andi %6, %8 : vector<1x256xi1>
    %14 = arith.andi %6, %10 : vector<1x256xi1>
    %c0 = arith.constant 0 : index
    %c0_1 = arith.constant 0 : index
    %c0_2 = arith.constant 0 : index
    %15 = vector.load %arg2[%c0, %c0_1, %c0_2] : memref<9x4x4xf32, #tpu.memory_space<vmem>>, vector<1x4x4xf32>
    %16 = vector.shape_cast %15 : vector<1x4x4xf32> to vector<4x4xf32>
    %17 = vector.extract_strided_slice %16 {offsets = [0, 0], sizes = [4, 1], strides = [1, 1]} : vector<4x4xf32> to vector<4x1xf32>
    %c0_3 = arith.constant 0 : index
    %c0_4 = arith.constant 0 : index
    %c0_5 = arith.constant 0 : index
    %18 = vector.load %arg2[%c0_3, %c0_4, %c0_5] : memref<9x4x4xf32, #tpu.memory_space<vmem>>, vector<1x4x4xf32>
    %19 = vector.shape_cast %18 : vector<1x4x4xf32> to vector<4x4xf32>
    %20 = vector.extract_strided_slice %19 {offsets = [0, 1], sizes = [4, 1], strides = [1, 1]} : vector<4x4xf32> to vector<4x1xf32>
    %c0_6 = arith.constant 0 : index
    %c0_7 = arith.constant 0 : index
    %c0_8 = arith.constant 0 : index
    %21 = vector.load %arg2[%c0_6, %c0_7, %c0_8] : memref<9x4x4xf32, #tpu.memory_space<vmem>>, vector<1x4x4xf32>
    %22 = vector.shape_cast %21 : vector<1x4x4xf32> to vector<4x4xf32>
    %23 = vector.extract_strided_slice %22 {offsets = [0, 2], sizes = [4, 1], strides = [1, 1]} : vector<4x4xf32> to vector<4x1xf32>
    %c0_9 = arith.constant 0 : index
    %c0_10 = arith.constant 0 : index
    %c0_11 = arith.constant 0 : index
    %24 = vector.load %arg2[%c0_9, %c0_10, %c0_11] : memref<9x4x4xf32, #tpu.memory_space<vmem>>, vector<1x4x4xf32>
    %25 = vector.shape_cast %24 : vector<1x4x4xf32> to vector<4x4xf32>
    %26 = vector.extract_strided_slice %25 {offsets = [0, 3], sizes = [4, 1], strides = [1, 1]} : vector<4x4xf32> to vector<4x1xf32>
    %c1 = arith.constant 1 : index
    %c0_12 = arith.constant 0 : index
    %c0_13 = arith.constant 0 : index
    %27 = vector.load %arg2[%c1, %c0_12, %c0_13] : memref<9x4x4xf32, #tpu.memory_space<vmem>>, vector<1x4x4xf32>
    %28 = vector.shape_cast %27 : vector<1x4x4xf32> to vector<4x4xf32>
    %29 = vector.extract_strided_slice %28 {offsets = [0, 0], sizes = [4, 1], strides = [1, 1]} : vector<4x4xf32> to vector<4x1xf32>
    %c1_14 = arith.constant 1 : index
    %c0_15 = arith.constant 0 : index
    %c0_16 = arith.constant 0 : index
    %30 = vector.load %arg2[%c1_14, %c0_15, %c0_16] : memref<9x4x4xf32, #tpu.memory_space<vmem>>, vector<1x4x4xf32>
    %31 = vector.shape_cast %30 : vector<1x4x4xf32> to vector<4x4xf32>
    %32 = vector.extract_strided_slice %31 {offsets = [0, 1], sizes = [4, 1], strides = [1, 1]} : vector<4x4xf32> to vector<4x1xf32>
    %c1_17 = arith.constant 1 : index
    %c0_18 = arith.constant 0 : index
    %c0_19 = arith.constant 0 : index
    %33 = vector.load %arg2[%c1_17, %c0_18, %c0_19] : memref<9x4x4xf32, #tpu.memory_space<vmem>>, vector<1x4x4xf32>
    %34 = vector.shape_cast %33 : vector<1x4x4xf32> to vector<4x4xf32>
    %35 = vector.extract_strided_slice %34 {offsets = [0, 2], sizes = [4, 1], strides = [1, 1]} : vector<4x4xf32> to vector<4x1xf32>
    %c1_20 = arith.constant 1 : index
    %c0_21 = arith.constant 0 : index
    %c0_22 = arith.constant 0 : index
    %36 = vector.load %arg2[%c1_20, %c0_21, %c0_22] : memref<9x4x4xf32, #tpu.memory_space<vmem>>, vector<1x4x4xf32>
    %37 = vector.shape_cast %36 : vector<1x4x4xf32> to vector<4x4xf32>
    %38 = vector.extract_strided_slice %37 {offsets = [0, 3], sizes = [4, 1], strides = [1, 1]} : vector<4x4xf32> to vector<4x1xf32>
    %c2 = arith.constant 2 : index
    %c0_23 = arith.constant 0 : index
    %c0_24 = arith.constant 0 : index
    %39 = vector.load %arg2[%c2, %c0_23, %c0_24] : memref<9x4x4xf32, #tpu.memory_space<vmem>>, vector<1x4x4xf32>
    %40 = vector.shape_cast %39 : vector<1x4x4xf32> to vector<4x4xf32>
    %41 = vector.extract_strided_slice %40 {offsets = [0, 0], sizes = [4, 1], strides = [1, 1]} : vector<4x4xf32> to vector<4x1xf32>
    %c2_25 = arith.constant 2 : index
    %c0_26 = arith.constant 0 : index
    %c0_27 = arith.constant 0 : index
    %42 = vector.load %arg2[%c2_25, %c0_26, %c0_27] : memref<9x4x4xf32, #tpu.memory_space<vmem>>, vector<1x4x4xf32>
    %43 = vector.shape_cast %42 : vector<1x4x4xf32> to vector<4x4xf32>
    %44 = vector.extract_strided_slice %43 {offsets = [0, 1], sizes = [4, 1], strides = [1, 1]} : vector<4x4xf32> to vector<4x1xf32>
    %c2_28 = arith.constant 2 : index
    %c0_29 = arith.constant 0 : index
    %c0_30 = arith.constant 0 : index
    %45 = vector.load %arg2[%c2_28, %c0_29, %c0_30] : memref<9x4x4xf32, #tpu.memory_space<vmem>>, vector<1x4x4xf32>
    %46 = vector.shape_cast %45 : vector<1x4x4xf32> to vector<4x4xf32>
    %47 = vector.extract_strided_slice %46 {offsets = [0, 2], sizes = [4, 1], strides = [1, 1]} : vector<4x4xf32> to vector<4x1xf32>
    %c2_31 = arith.constant 2 : index
    %c0_32 = arith.constant 0 : index
    %c0_33 = arith.constant 0 : index
    %48 = vector.load %arg2[%c2_31, %c0_32, %c0_33] : memref<9x4x4xf32, #tpu.memory_space<vmem>>, vector<1x4x4xf32>
    %49 = vector.shape_cast %48 : vector<1x4x4xf32> to vector<4x4xf32>
    %50 = vector.extract_strided_slice %49 {offsets = [0, 3], sizes = [4, 1], strides = [1, 1]} : vector<4x4xf32> to vector<4x1xf32>
    %c3 = arith.constant 3 : index
    %c0_34 = arith.constant 0 : index
    %c0_35 = arith.constant 0 : index
    %51 = vector.load %arg2[%c3, %c0_34, %c0_35] : memref<9x4x4xf32, #tpu.memory_space<vmem>>, vector<1x4x4xf32>
    %52 = vector.shape_cast %51 : vector<1x4x4xf32> to vector<4x4xf32>
    %53 = vector.extract_strided_slice %52 {offsets = [0, 0], sizes = [4, 1], strides = [1, 1]} : vector<4x4xf32> to vector<4x1xf32>
    %c3_36 = arith.constant 3 : index
    %c0_37 = arith.constant 0 : index
    %c0_38 = arith.constant 0 : index
    %54 = vector.load %arg2[%c3_36, %c0_37, %c0_38] : memref<9x4x4xf32, #tpu.memory_space<vmem>>, vector<1x4x4xf32>
    %55 = vector.shape_cast %54 : vector<1x4x4xf32> to vector<4x4xf32>
    %56 = vector.extract_strided_slice %55 {offsets = [0, 1], sizes = [4, 1], strides = [1, 1]} : vector<4x4xf32> to vector<4x1xf32>
    %c3_39 = arith.constant 3 : index
    %c0_40 = arith.constant 0 : index
    %c0_41 = arith.constant 0 : index
    %57 = vector.load %arg2[%c3_39, %c0_40, %c0_41] : memref<9x4x4xf32, #tpu.memory_space<vmem>>, vector<1x4x4xf32>
    %58 = vector.shape_cast %57 : vector<1x4x4xf32> to vector<4x4xf32>
    %59 = vector.extract_strided_slice %58 {offsets = [0, 2], sizes = [4, 1], strides = [1, 1]} : vector<4x4xf32> to vector<4x1xf32>
    %c3_42 = arith.constant 3 : index
    %c0_43 = arith.constant 0 : index
    %c0_44 = arith.constant 0 : index
    %60 = vector.load %arg2[%c3_42, %c0_43, %c0_44] : memref<9x4x4xf32, #tpu.memory_space<vmem>>, vector<1x4x4xf32>
    %61 = vector.shape_cast %60 : vector<1x4x4xf32> to vector<4x4xf32>
    %62 = vector.extract_strided_slice %61 {offsets = [0, 3], sizes = [4, 1], strides = [1, 1]} : vector<4x4xf32> to vector<4x1xf32>
    %c4 = arith.constant 4 : index
    %c0_45 = arith.constant 0 : index
    %c0_46 = arith.constant 0 : index
    %63 = vector.load %arg2[%c4, %c0_45, %c0_46] : memref<9x4x4xf32, #tpu.memory_space<vmem>>, vector<1x4x4xf32>
    %64 = vector.shape_cast %63 : vector<1x4x4xf32> to vector<4x4xf32>
    %65 = vector.extract_strided_slice %64 {offsets = [0, 0], sizes = [4, 1], strides = [1, 1]} : vector<4x4xf32> to vector<4x1xf32>
    %c4_47 = arith.constant 4 : index
    %c0_48 = arith.constant 0 : index
    %c0_49 = arith.constant 0 : index
    %66 = vector.load %arg2[%c4_47, %c0_48, %c0_49] : memref<9x4x4xf32, #tpu.memory_space<vmem>>, vector<1x4x4xf32>
    %67 = vector.shape_cast %66 : vector<1x4x4xf32> to vector<4x4xf32>
    %68 = vector.extract_strided_slice %67 {offsets = [0, 1], sizes = [4, 1], strides = [1, 1]} : vector<4x4xf32> to vector<4x1xf32>
    %c4_50 = arith.constant 4 : index
    %c0_51 = arith.constant 0 : index
    %c0_52 = arith.constant 0 : index
    %69 = vector.load %arg2[%c4_50, %c0_51, %c0_52] : memref<9x4x4xf32, #tpu.memory_space<vmem>>, vector<1x4x4xf32>
    %70 = vector.shape_cast %69 : vector<1x4x4xf32> to vector<4x4xf32>
    %71 = vector.extract_strided_slice %70 {offsets = [0, 2], sizes = [4, 1], strides = [1, 1]} : vector<4x4xf32> to vector<4x1xf32>
    %c4_53 = arith.constant 4 : index
    %c0_54 = arith.constant 0 : index
    %c0_55 = arith.constant 0 : index
    %72 = vector.load %arg2[%c4_53, %c0_54, %c0_55] : memref<9x4x4xf32, #tpu.memory_space<vmem>>, vector<1x4x4xf32>
    %73 = vector.shape_cast %72 : vector<1x4x4xf32> to vector<4x4xf32>
    %74 = vector.extract_strided_slice %73 {offsets = [0, 3], sizes = [4, 1], strides = [1, 1]} : vector<4x4xf32> to vector<4x1xf32>
    %c5 = arith.constant 5 : index
    %c0_56 = arith.constant 0 : index
    %c0_57 = arith.constant 0 : index
    %75 = vector.load %arg2[%c5, %c0_56, %c0_57] : memref<9x4x4xf32, #tpu.memory_space<vmem>>, vector<1x4x4xf32>
    %76 = vector.shape_cast %75 : vector<1x4x4xf32> to vector<4x4xf32>
    %77 = vector.extract_strided_slice %76 {offsets = [0, 0], sizes = [4, 1], strides = [1, 1]} : vector<4x4xf32> to vector<4x1xf32>
    %c5_58 = arith.constant 5 : index
    %c0_59 = arith.constant 0 : index
    %c0_60 = arith.constant 0 : index
    %78 = vector.load %arg2[%c5_58, %c0_59, %c0_60] : memref<9x4x4xf32, #tpu.memory_space<vmem>>, vector<1x4x4xf32>
    %79 = vector.shape_cast %78 : vector<1x4x4xf32> to vector<4x4xf32>
    %80 = vector.extract_strided_slice %79 {offsets = [0, 1], sizes = [4, 1], strides = [1, 1]} : vector<4x4xf32> to vector<4x1xf32>
    %c5_61 = arith.constant 5 : index
    %c0_62 = arith.constant 0 : index
    %c0_63 = arith.constant 0 : index
    %81 = vector.load %arg2[%c5_61, %c0_62, %c0_63] : memref<9x4x4xf32, #tpu.memory_space<vmem>>, vector<1x4x4xf32>
    %82 = vector.shape_cast %81 : vector<1x4x4xf32> to vector<4x4xf32>
    %83 = vector.extract_strided_slice %82 {offsets = [0, 2], sizes = [4, 1], strides = [1, 1]} : vector<4x4xf32> to vector<4x1xf32>
    %c5_64 = arith.constant 5 : index
    %c0_65 = arith.constant 0 : index
    %c0_66 = arith.constant 0 : index
    %84 = vector.load %arg2[%c5_64, %c0_65, %c0_66] : memref<9x4x4xf32, #tpu.memory_space<vmem>>, vector<1x4x4xf32>
    %85 = vector.shape_cast %84 : vector<1x4x4xf32> to vector<4x4xf32>
    %86 = vector.extract_strided_slice %85 {offsets = [0, 3], sizes = [4, 1], strides = [1, 1]} : vector<4x4xf32> to vector<4x1xf32>
    %c6 = arith.constant 6 : index
    %c0_67 = arith.constant 0 : index
    %c0_68 = arith.constant 0 : index
    %87 = vector.load %arg2[%c6, %c0_67, %c0_68] : memref<9x4x4xf32, #tpu.memory_space<vmem>>, vector<1x4x4xf32>
    %88 = vector.shape_cast %87 : vector<1x4x4xf32> to vector<4x4xf32>
    %89 = vector.extract_strided_slice %88 {offsets = [0, 0], sizes = [4, 1], strides = [1, 1]} : vector<4x4xf32> to vector<4x1xf32>
    %c6_69 = arith.constant 6 : index
    %c0_70 = arith.constant 0 : index
    %c0_71 = arith.constant 0 : index
    %90 = vector.load %arg2[%c6_69, %c0_70, %c0_71] : memref<9x4x4xf32, #tpu.memory_space<vmem>>, vector<1x4x4xf32>
    %91 = vector.shape_cast %90 : vector<1x4x4xf32> to vector<4x4xf32>
    %92 = vector.extract_strided_slice %91 {offsets = [0, 1], sizes = [4, 1], strides = [1, 1]} : vector<4x4xf32> to vector<4x1xf32>
    %c6_72 = arith.constant 6 : index
    %c0_73 = arith.constant 0 : index
    %c0_74 = arith.constant 0 : index
    %93 = vector.load %arg2[%c6_72, %c0_73, %c0_74] : memref<9x4x4xf32, #tpu.memory_space<vmem>>, vector<1x4x4xf32>
    %94 = vector.shape_cast %93 : vector<1x4x4xf32> to vector<4x4xf32>
    %95 = vector.extract_strided_slice %94 {offsets = [0, 2], sizes = [4, 1], strides = [1, 1]} : vector<4x4xf32> to vector<4x1xf32>
    %c6_75 = arith.constant 6 : index
    %c0_76 = arith.constant 0 : index
    %c0_77 = arith.constant 0 : index
    %96 = vector.load %arg2[%c6_75, %c0_76, %c0_77] : memref<9x4x4xf32, #tpu.memory_space<vmem>>, vector<1x4x4xf32>
    %97 = vector.shape_cast %96 : vector<1x4x4xf32> to vector<4x4xf32>
    %98 = vector.extract_strided_slice %97 {offsets = [0, 3], sizes = [4, 1], strides = [1, 1]} : vector<4x4xf32> to vector<4x1xf32>
    %c7 = arith.constant 7 : index
    %c0_78 = arith.constant 0 : index
    %c0_79 = arith.constant 0 : index
    %99 = vector.load %arg2[%c7, %c0_78, %c0_79] : memref<9x4x4xf32, #tpu.memory_space<vmem>>, vector<1x4x4xf32>
    %100 = vector.shape_cast %99 : vector<1x4x4xf32> to vector<4x4xf32>
    %101 = vector.extract_strided_slice %100 {offsets = [0, 0], sizes = [4, 1], strides = [1, 1]} : vector<4x4xf32> to vector<4x1xf32>
    %c7_80 = arith.constant 7 : index
    %c0_81 = arith.constant 0 : index
    %c0_82 = arith.constant 0 : index
    %102 = vector.load %arg2[%c7_80, %c0_81, %c0_82] : memref<9x4x4xf32, #tpu.memory_space<vmem>>, vector<1x4x4xf32>
    %103 = vector.shape_cast %102 : vector<1x4x4xf32> to vector<4x4xf32>
    %104 = vector.extract_strided_slice %103 {offsets = [0, 1], sizes = [4, 1], strides = [1, 1]} : vector<4x4xf32> to vector<4x1xf32>
    %c7_83 = arith.constant 7 : index
    %c0_84 = arith.constant 0 : index
    %c0_85 = arith.constant 0 : index
    %105 = vector.load %arg2[%c7_83, %c0_84, %c0_85] : memref<9x4x4xf32, #tpu.memory_space<vmem>>, vector<1x4x4xf32>
    %106 = vector.shape_cast %105 : vector<1x4x4xf32> to vector<4x4xf32>
    %107 = vector.extract_strided_slice %106 {offsets = [0, 2], sizes = [4, 1], strides = [1, 1]} : vector<4x4xf32> to vector<4x1xf32>
    %c7_86 = arith.constant 7 : index
    %c0_87 = arith.constant 0 : index
    %c0_88 = arith.constant 0 : index
    %108 = vector.load %arg2[%c7_86, %c0_87, %c0_88] : memref<9x4x4xf32, #tpu.memory_space<vmem>>, vector<1x4x4xf32>
    %109 = vector.shape_cast %108 : vector<1x4x4xf32> to vector<4x4xf32>
    %110 = vector.extract_strided_slice %109 {offsets = [0, 3], sizes = [4, 1], strides = [1, 1]} : vector<4x4xf32> to vector<4x1xf32>
    %c8 = arith.constant 8 : index
    %c0_89 = arith.constant 0 : index
    %c0_90 = arith.constant 0 : index
    %111 = vector.load %arg2[%c8, %c0_89, %c0_90] : memref<9x4x4xf32, #tpu.memory_space<vmem>>, vector<1x4x4xf32>
    %112 = vector.shape_cast %111 : vector<1x4x4xf32> to vector<4x4xf32>
    %113 = vector.extract_strided_slice %112 {offsets = [0, 0], sizes = [4, 1], strides = [1, 1]} : vector<4x4xf32> to vector<4x1xf32>
    %c8_91 = arith.constant 8 : index
    %c0_92 = arith.constant 0 : index
    %c0_93 = arith.constant 0 : index
    %114 = vector.load %arg2[%c8_91, %c0_92, %c0_93] : memref<9x4x4xf32, #tpu.memory_space<vmem>>, vector<1x4x4xf32>
    %115 = vector.shape_cast %114 : vector<1x4x4xf32> to vector<4x4xf32>
    %116 = vector.extract_strided_slice %115 {offsets = [0, 1], sizes = [4, 1], strides = [1, 1]} : vector<4x4xf32> to vector<4x1xf32>
    %c8_94 = arith.constant 8 : index
    %c0_95 = arith.constant 0 : index
    %c0_96 = arith.constant 0 : index
    %117 = vector.load %arg2[%c8_94, %c0_95, %c0_96] : memref<9x4x4xf32, #tpu.memory_space<vmem>>, vector<1x4x4xf32>
    %118 = vector.shape_cast %117 : vector<1x4x4xf32> to vector<4x4xf32>
    %119 = vector.extract_strided_slice %118 {offsets = [0, 2], sizes = [4, 1], strides = [1, 1]} : vector<4x4xf32> to vector<4x1xf32>
    %c8_97 = arith.constant 8 : index
    %c0_98 = arith.constant 0 : index
    %c0_99 = arith.constant 0 : index
    %120 = vector.load %arg2[%c8_97, %c0_98, %c0_99] : memref<9x4x4xf32, #tpu.memory_space<vmem>>, vector<1x4x4xf32>
    %121 = vector.shape_cast %120 : vector<1x4x4xf32> to vector<4x4xf32>
    %122 = vector.extract_strided_slice %121 {offsets = [0, 3], sizes = [4, 1], strides = [1, 1]} : vector<4x4xf32> to vector<4x1xf32>
    %c0_100 = arith.constant 0 : index
    %c0_101 = arith.constant 0 : index
    %c0_102 = arith.constant 0 : index
    %123 = vector.load %arg4[%c0_100, %c0_101, %c0_102] : memref<9x4x4xf32, #tpu.memory_space<vmem>>, vector<1x4x4xf32>
    %124 = vector.shape_cast %123 : vector<1x4x4xf32> to vector<4x4xf32>
    %125 = vector.extract_strided_slice %124 {offsets = [0, 0], sizes = [4, 1], strides = [1, 1]} : vector<4x4xf32> to vector<4x1xf32>
    %c0_103 = arith.constant 0 : index
    %c0_104 = arith.constant 0 : index
    %c0_105 = arith.constant 0 : index
    %126 = vector.load %arg4[%c0_103, %c0_104, %c0_105] : memref<9x4x4xf32, #tpu.memory_space<vmem>>, vector<1x4x4xf32>
    %127 = vector.shape_cast %126 : vector<1x4x4xf32> to vector<4x4xf32>
    %128 = vector.extract_strided_slice %127 {offsets = [0, 1], sizes = [4, 1], strides = [1, 1]} : vector<4x4xf32> to vector<4x1xf32>
    %c0_106 = arith.constant 0 : index
    %c0_107 = arith.constant 0 : index
    %c0_108 = arith.constant 0 : index
    %129 = vector.load %arg4[%c0_106, %c0_107, %c0_108] : memref<9x4x4xf32, #tpu.memory_space<vmem>>, vector<1x4x4xf32>
    %130 = vector.shape_cast %129 : vector<1x4x4xf32> to vector<4x4xf32>
    %131 = vector.extract_strided_slice %130 {offsets = [0, 2], sizes = [4, 1], strides = [1, 1]} : vector<4x4xf32> to vector<4x1xf32>
    %c0_109 = arith.constant 0 : index
    %c0_110 = arith.constant 0 : index
    %c0_111 = arith.constant 0 : index
    %132 = vector.load %arg4[%c0_109, %c0_110, %c0_111] : memref<9x4x4xf32, #tpu.memory_space<vmem>>, vector<1x4x4xf32>
    %133 = vector.shape_cast %132 : vector<1x4x4xf32> to vector<4x4xf32>
    %134 = vector.extract_strided_slice %133 {offsets = [0, 3], sizes = [4, 1], strides = [1, 1]} : vector<4x4xf32> to vector<4x1xf32>
    %c1_112 = arith.constant 1 : index
    %c0_113 = arith.constant 0 : index
    %c0_114 = arith.constant 0 : index
    %135 = vector.load %arg4[%c1_112, %c0_113, %c0_114] : memref<9x4x4xf32, #tpu.memory_space<vmem>>, vector<1x4x4xf32>
    %136 = vector.shape_cast %135 : vector<1x4x4xf32> to vector<4x4xf32>
    %137 = vector.extract_strided_slice %136 {offsets = [0, 0], sizes = [4, 1], strides = [1, 1]} : vector<4x4xf32> to vector<4x1xf32>
    %c1_115 = arith.constant 1 : index
    %c0_116 = arith.constant 0 : index
    %c0_117 = arith.constant 0 : index
    %138 = vector.load %arg4[%c1_115, %c0_116, %c0_117] : memref<9x4x4xf32, #tpu.memory_space<vmem>>, vector<1x4x4xf32>
    %139 = vector.shape_cast %138 : vector<1x4x4xf32> to vector<4x4xf32>
    %140 = vector.extract_strided_slice %139 {offsets = [0, 1], sizes = [4, 1], strides = [1, 1]} : vector<4x4xf32> to vector<4x1xf32>
    %c1_118 = arith.constant 1 : index
    %c0_119 = arith.constant 0 : index
    %c0_120 = arith.constant 0 : index
    %141 = vector.load %arg4[%c1_118, %c0_119, %c0_120] : memref<9x4x4xf32, #tpu.memory_space<vmem>>, vector<1x4x4xf32>
    %142 = vector.shape_cast %141 : vector<1x4x4xf32> to vector<4x4xf32>
    %143 = vector.extract_strided_slice %142 {offsets = [0, 2], sizes = [4, 1], strides = [1, 1]} : vector<4x4xf32> to vector<4x1xf32>
    %c1_121 = arith.constant 1 : index
    %c0_122 = arith.constant 0 : index
    %c0_123 = arith.constant 0 : index
    %144 = vector.load %arg4[%c1_121, %c0_122, %c0_123] : memref<9x4x4xf32, #tpu.memory_space<vmem>>, vector<1x4x4xf32>
    %145 = vector.shape_cast %144 : vector<1x4x4xf32> to vector<4x4xf32>
    %146 = vector.extract_strided_slice %145 {offsets = [0, 3], sizes = [4, 1], strides = [1, 1]} : vector<4x4xf32> to vector<4x1xf32>
    %c2_124 = arith.constant 2 : index
    %c0_125 = arith.constant 0 : index
    %c0_126 = arith.constant 0 : index
    %147 = vector.load %arg4[%c2_124, %c0_125, %c0_126] : memref<9x4x4xf32, #tpu.memory_space<vmem>>, vector<1x4x4xf32>
    %148 = vector.shape_cast %147 : vector<1x4x4xf32> to vector<4x4xf32>
    %149 = vector.extract_strided_slice %148 {offsets = [0, 0], sizes = [4, 1], strides = [1, 1]} : vector<4x4xf32> to vector<4x1xf32>
    %c2_127 = arith.constant 2 : index
    %c0_128 = arith.constant 0 : index
    %c0_129 = arith.constant 0 : index
    %150 = vector.load %arg4[%c2_127, %c0_128, %c0_129] : memref<9x4x4xf32, #tpu.memory_space<vmem>>, vector<1x4x4xf32>
    %151 = vector.shape_cast %150 : vector<1x4x4xf32> to vector<4x4xf32>
    %152 = vector.extract_strided_slice %151 {offsets = [0, 1], sizes = [4, 1], strides = [1, 1]} : vector<4x4xf32> to vector<4x1xf32>
    %c2_130 = arith.constant 2 : index
    %c0_131 = arith.constant 0 : index
    %c0_132 = arith.constant 0 : index
    %153 = vector.load %arg4[%c2_130, %c0_131, %c0_132] : memref<9x4x4xf32, #tpu.memory_space<vmem>>, vector<1x4x4xf32>
    %154 = vector.shape_cast %153 : vector<1x4x4xf32> to vector<4x4xf32>
    %155 = vector.extract_strided_slice %154 {offsets = [0, 2], sizes = [4, 1], strides = [1, 1]} : vector<4x4xf32> to vector<4x1xf32>
    %c2_133 = arith.constant 2 : index
    %c0_134 = arith.constant 0 : index
    %c0_135 = arith.constant 0 : index
    %156 = vector.load %arg4[%c2_133, %c0_134, %c0_135] : memref<9x4x4xf32, #tpu.memory_space<vmem>>, vector<1x4x4xf32>
    %157 = vector.shape_cast %156 : vector<1x4x4xf32> to vector<4x4xf32>
    %158 = vector.extract_strided_slice %157 {offsets = [0, 3], sizes = [4, 1], strides = [1, 1]} : vector<4x4xf32> to vector<4x1xf32>
    %c3_136 = arith.constant 3 : index
    %c0_137 = arith.constant 0 : index
    %c0_138 = arith.constant 0 : index
    %159 = vector.load %arg4[%c3_136, %c0_137, %c0_138] : memref<9x4x4xf32, #tpu.memory_space<vmem>>, vector<1x4x4xf32>
    %160 = vector.shape_cast %159 : vector<1x4x4xf32> to vector<4x4xf32>
    %161 = vector.extract_strided_slice %160 {offsets = [0, 0], sizes = [4, 1], strides = [1, 1]} : vector<4x4xf32> to vector<4x1xf32>
    %c3_139 = arith.constant 3 : index
    %c0_140 = arith.constant 0 : index
    %c0_141 = arith.constant 0 : index
    %162 = vector.load %arg4[%c3_139, %c0_140, %c0_141] : memref<9x4x4xf32, #tpu.memory_space<vmem>>, vector<1x4x4xf32>
    %163 = vector.shape_cast %162 : vector<1x4x4xf32> to vector<4x4xf32>
    %164 = vector.extract_strided_slice %163 {offsets = [0, 1], sizes = [4, 1], strides = [1, 1]} : vector<4x4xf32> to vector<4x1xf32>
    %c3_142 = arith.constant 3 : index
    %c0_143 = arith.constant 0 : index
    %c0_144 = arith.constant 0 : index
    %165 = vector.load %arg4[%c3_142, %c0_143, %c0_144] : memref<9x4x4xf32, #tpu.memory_space<vmem>>, vector<1x4x4xf32>
    %166 = vector.shape_cast %165 : vector<1x4x4xf32> to vector<4x4xf32>
    %167 = vector.extract_strided_slice %166 {offsets = [0, 2], sizes = [4, 1], strides = [1, 1]} : vector<4x4xf32> to vector<4x1xf32>
    %c3_145 = arith.constant 3 : index
    %c0_146 = arith.constant 0 : index
    %c0_147 = arith.constant 0 : index
    %168 = vector.load %arg4[%c3_145, %c0_146, %c0_147] : memref<9x4x4xf32, #tpu.memory_space<vmem>>, vector<1x4x4xf32>
    %169 = vector.shape_cast %168 : vector<1x4x4xf32> to vector<4x4xf32>
    %170 = vector.extract_strided_slice %169 {offsets = [0, 3], sizes = [4, 1], strides = [1, 1]} : vector<4x4xf32> to vector<4x1xf32>
    %c4_148 = arith.constant 4 : index
    %c0_149 = arith.constant 0 : index
    %c0_150 = arith.constant 0 : index
    %171 = vector.load %arg4[%c4_148, %c0_149, %c0_150] : memref<9x4x4xf32, #tpu.memory_space<vmem>>, vector<1x4x4xf32>
    %172 = vector.shape_cast %171 : vector<1x4x4xf32> to vector<4x4xf32>
    %173 = vector.extract_strided_slice %172 {offsets = [0, 0], sizes = [4, 1], strides = [1, 1]} : vector<4x4xf32> to vector<4x1xf32>
    %c4_151 = arith.constant 4 : index
    %c0_152 = arith.constant 0 : index
    %c0_153 = arith.constant 0 : index
    %174 = vector.load %arg4[%c4_151, %c0_152, %c0_153] : memref<9x4x4xf32, #tpu.memory_space<vmem>>, vector<1x4x4xf32>
    %175 = vector.shape_cast %174 : vector<1x4x4xf32> to vector<4x4xf32>
    %176 = vector.extract_strided_slice %175 {offsets = [0, 1], sizes = [4, 1], strides = [1, 1]} : vector<4x4xf32> to vector<4x1xf32>
    %c4_154 = arith.constant 4 : index
    %c0_155 = arith.constant 0 : index
    %c0_156 = arith.constant 0 : index
    %177 = vector.load %arg4[%c4_154, %c0_155, %c0_156] : memref<9x4x4xf32, #tpu.memory_space<vmem>>, vector<1x4x4xf32>
    %178 = vector.shape_cast %177 : vector<1x4x4xf32> to vector<4x4xf32>
    %179 = vector.extract_strided_slice %178 {offsets = [0, 2], sizes = [4, 1], strides = [1, 1]} : vector<4x4xf32> to vector<4x1xf32>
    %c4_157 = arith.constant 4 : index
    %c0_158 = arith.constant 0 : index
    %c0_159 = arith.constant 0 : index
    %180 = vector.load %arg4[%c4_157, %c0_158, %c0_159] : memref<9x4x4xf32, #tpu.memory_space<vmem>>, vector<1x4x4xf32>
    %181 = vector.shape_cast %180 : vector<1x4x4xf32> to vector<4x4xf32>
    %182 = vector.extract_strided_slice %181 {offsets = [0, 3], sizes = [4, 1], strides = [1, 1]} : vector<4x4xf32> to vector<4x1xf32>
    %c5_160 = arith.constant 5 : index
    %c0_161 = arith.constant 0 : index
    %c0_162 = arith.constant 0 : index
    %183 = vector.load %arg4[%c5_160, %c0_161, %c0_162] : memref<9x4x4xf32, #tpu.memory_space<vmem>>, vector<1x4x4xf32>
    %184 = vector.shape_cast %183 : vector<1x4x4xf32> to vector<4x4xf32>
    %185 = vector.extract_strided_slice %184 {offsets = [0, 0], sizes = [4, 1], strides = [1, 1]} : vector<4x4xf32> to vector<4x1xf32>
    %c5_163 = arith.constant 5 : index
    %c0_164 = arith.constant 0 : index
    %c0_165 = arith.constant 0 : index
    %186 = vector.load %arg4[%c5_163, %c0_164, %c0_165] : memref<9x4x4xf32, #tpu.memory_space<vmem>>, vector<1x4x4xf32>
    %187 = vector.shape_cast %186 : vector<1x4x4xf32> to vector<4x4xf32>
    %188 = vector.extract_strided_slice %187 {offsets = [0, 1], sizes = [4, 1], strides = [1, 1]} : vector<4x4xf32> to vector<4x1xf32>
    %c5_166 = arith.constant 5 : index
    %c0_167 = arith.constant 0 : index
    %c0_168 = arith.constant 0 : index
    %189 = vector.load %arg4[%c5_166, %c0_167, %c0_168] : memref<9x4x4xf32, #tpu.memory_space<vmem>>, vector<1x4x4xf32>
    %190 = vector.shape_cast %189 : vector<1x4x4xf32> to vector<4x4xf32>
    %191 = vector.extract_strided_slice %190 {offsets = [0, 2], sizes = [4, 1], strides = [1, 1]} : vector<4x4xf32> to vector<4x1xf32>
    %c5_169 = arith.constant 5 : index
    %c0_170 = arith.constant 0 : index
    %c0_171 = arith.constant 0 : index
    %192 = vector.load %arg4[%c5_169, %c0_170, %c0_171] : memref<9x4x4xf32, #tpu.memory_space<vmem>>, vector<1x4x4xf32>
    %193 = vector.shape_cast %192 : vector<1x4x4xf32> to vector<4x4xf32>
    %194 = vector.extract_strided_slice %193 {offsets = [0, 3], sizes = [4, 1], strides = [1, 1]} : vector<4x4xf32> to vector<4x1xf32>
    %c6_172 = arith.constant 6 : index
    %c0_173 = arith.constant 0 : index
    %c0_174 = arith.constant 0 : index
    %195 = vector.load %arg4[%c6_172, %c0_173, %c0_174] : memref<9x4x4xf32, #tpu.memory_space<vmem>>, vector<1x4x4xf32>
    %196 = vector.shape_cast %195 : vector<1x4x4xf32> to vector<4x4xf32>
    %197 = vector.extract_strided_slice %196 {offsets = [0, 0], sizes = [4, 1], strides = [1, 1]} : vector<4x4xf32> to vector<4x1xf32>
    %c6_175 = arith.constant 6 : index
    %c0_176 = arith.constant 0 : index
    %c0_177 = arith.constant 0 : index
    %198 = vector.load %arg4[%c6_175, %c0_176, %c0_177] : memref<9x4x4xf32, #tpu.memory_space<vmem>>, vector<1x4x4xf32>
    %199 = vector.shape_cast %198 : vector<1x4x4xf32> to vector<4x4xf32>
    %200 = vector.extract_strided_slice %199 {offsets = [0, 1], sizes = [4, 1], strides = [1, 1]} : vector<4x4xf32> to vector<4x1xf32>
    %c6_178 = arith.constant 6 : index
    %c0_179 = arith.constant 0 : index
    %c0_180 = arith.constant 0 : index
    %201 = vector.load %arg4[%c6_178, %c0_179, %c0_180] : memref<9x4x4xf32, #tpu.memory_space<vmem>>, vector<1x4x4xf32>
    %202 = vector.shape_cast %201 : vector<1x4x4xf32> to vector<4x4xf32>
    %203 = vector.extract_strided_slice %202 {offsets = [0, 2], sizes = [4, 1], strides = [1, 1]} : vector<4x4xf32> to vector<4x1xf32>
    %c6_181 = arith.constant 6 : index
    %c0_182 = arith.constant 0 : index
    %c0_183 = arith.constant 0 : index
    %204 = vector.load %arg4[%c6_181, %c0_182, %c0_183] : memref<9x4x4xf32, #tpu.memory_space<vmem>>, vector<1x4x4xf32>
    %205 = vector.shape_cast %204 : vector<1x4x4xf32> to vector<4x4xf32>
    %206 = vector.extract_strided_slice %205 {offsets = [0, 3], sizes = [4, 1], strides = [1, 1]} : vector<4x4xf32> to vector<4x1xf32>
    %c7_184 = arith.constant 7 : index
    %c0_185 = arith.constant 0 : index
    %c0_186 = arith.constant 0 : index
    %207 = vector.load %arg4[%c7_184, %c0_185, %c0_186] : memref<9x4x4xf32, #tpu.memory_space<vmem>>, vector<1x4x4xf32>
    %208 = vector.shape_cast %207 : vector<1x4x4xf32> to vector<4x4xf32>
    %209 = vector.extract_strided_slice %208 {offsets = [0, 0], sizes = [4, 1], strides = [1, 1]} : vector<4x4xf32> to vector<4x1xf32>
    %c7_187 = arith.constant 7 : index
    %c0_188 = arith.constant 0 : index
    %c0_189 = arith.constant 0 : index
    %210 = vector.load %arg4[%c7_187, %c0_188, %c0_189] : memref<9x4x4xf32, #tpu.memory_space<vmem>>, vector<1x4x4xf32>
    %211 = vector.shape_cast %210 : vector<1x4x4xf32> to vector<4x4xf32>
    %212 = vector.extract_strided_slice %211 {offsets = [0, 1], sizes = [4, 1], strides = [1, 1]} : vector<4x4xf32> to vector<4x1xf32>
    %c7_190 = arith.constant 7 : index
    %c0_191 = arith.constant 0 : index
    %c0_192 = arith.constant 0 : index
    %213 = vector.load %arg4[%c7_190, %c0_191, %c0_192] : memref<9x4x4xf32, #tpu.memory_space<vmem>>, vector<1x4x4xf32>
    %214 = vector.shape_cast %213 : vector<1x4x4xf32> to vector<4x4xf32>
    %215 = vector.extract_strided_slice %214 {offsets = [0, 2], sizes = [4, 1], strides = [1, 1]} : vector<4x4xf32> to vector<4x1xf32>
    %c7_193 = arith.constant 7 : index
    %c0_194 = arith.constant 0 : index
    %c0_195 = arith.constant 0 : index
    %216 = vector.load %arg4[%c7_193, %c0_194, %c0_195] : memref<9x4x4xf32, #tpu.memory_space<vmem>>, vector<1x4x4xf32>
    %217 = vector.shape_cast %216 : vector<1x4x4xf32> to vector<4x4xf32>
    %218 = vector.extract_strided_slice %217 {offsets = [0, 3], sizes = [4, 1], strides = [1, 1]} : vector<4x4xf32> to vector<4x1xf32>
    %c8_196 = arith.constant 8 : index
    %c0_197 = arith.constant 0 : index
    %c0_198 = arith.constant 0 : index
    %219 = vector.load %arg4[%c8_196, %c0_197, %c0_198] : memref<9x4x4xf32, #tpu.memory_space<vmem>>, vector<1x4x4xf32>
    %220 = vector.shape_cast %219 : vector<1x4x4xf32> to vector<4x4xf32>
    %221 = vector.extract_strided_slice %220 {offsets = [0, 0], sizes = [4, 1], strides = [1, 1]} : vector<4x4xf32> to vector<4x1xf32>
    %c8_199 = arith.constant 8 : index
    %c0_200 = arith.constant 0 : index
    %c0_201 = arith.constant 0 : index
    %222 = vector.load %arg4[%c8_199, %c0_200, %c0_201] : memref<9x4x4xf32, #tpu.memory_space<vmem>>, vector<1x4x4xf32>
    %223 = vector.shape_cast %222 : vector<1x4x4xf32> to vector<4x4xf32>
    %224 = vector.extract_strided_slice %223 {offsets = [0, 1], sizes = [4, 1], strides = [1, 1]} : vector<4x4xf32> to vector<4x1xf32>
    %c8_202 = arith.constant 8 : index
    %c0_203 = arith.constant 0 : index
    %c0_204 = arith.constant 0 : index
    %225 = vector.load %arg4[%c8_202, %c0_203, %c0_204] : memref<9x4x4xf32, #tpu.memory_space<vmem>>, vector<1x4x4xf32>
    %226 = vector.shape_cast %225 : vector<1x4x4xf32> to vector<4x4xf32>
    %227 = vector.extract_strided_slice %226 {offsets = [0, 2], sizes = [4, 1], strides = [1, 1]} : vector<4x4xf32> to vector<4x1xf32>
    %c8_205 = arith.constant 8 : index
    %c0_206 = arith.constant 0 : index
    %c0_207 = arith.constant 0 : index
    %228 = vector.load %arg4[%c8_205, %c0_206, %c0_207] : memref<9x4x4xf32, #tpu.memory_space<vmem>>, vector<1x4x4xf32>
    %229 = vector.shape_cast %228 : vector<1x4x4xf32> to vector<4x4xf32>
    %230 = vector.extract_strided_slice %229 {offsets = [0, 3], sizes = [4, 1], strides = [1, 1]} : vector<4x4xf32> to vector<4x1xf32>
    %c0_208 = arith.constant 0 : index
    %c0_209 = arith.constant 0 : index
    %231 = vector.load %arg3[%c0_208, %c0_209] : memref<4x1xf32, #tpu.memory_space<vmem>>, vector<4x1xf32>
    %c0_210 = arith.constant 0 : index
    %c0_211 = arith.constant 0 : index
    %232 = vector.load %arg5[%c0_210, %c0_211] : memref<4x1xf32, #tpu.memory_space<vmem>>, vector<4x1xf32>
    %c0_212 = arith.constant 0 : index
    %c0_213 = arith.constant 0 : index
    %c0_214 = arith.constant 0 : index
    %233 = vector.load %arg1[%c0_212, %c0_213, %c0_214] : memref<1x4x256xf32, #tpu.memory_space<vmem>>, vector<1x4x256xf32>
    %234 = vector.shape_cast %233 : vector<1x4x256xf32> to vector<4x256xf32>
    %c17_i32 = arith.constant 17 : i32
    %235 = tpu.dynamic_rotate %234 by %c17_i32 dim 1 : vector<4x256xf32>, i32 -> vector<4x256xf32>
    %cst = arith.constant 0.000000e+00 : f32
    %236 = vector.shape_cast %11 : vector<1x256xi1> to vector<1x256xi1>
    %237 = vector.broadcast %236 : vector<1x256xi1> to vector<4x256xi1>
    %238 = vector.broadcast %cst : f32 to vector<4x256xf32>
    %239 = arith.select %237, %235, %238 : vector<4x256xi1>, vector<4x256xf32>
    %240 = vector.extract_strided_slice %239 {offsets = [0, 0], sizes = [1, 256], strides = [1, 1]} : vector<4x256xf32> to vector<1x256xf32>
    %241 = vector.broadcast %17 : vector<4x1xf32> to vector<4x256xf32>
    %242 = vector.broadcast %240 : vector<1x256xf32> to vector<4x256xf32>
    %243 = arith.mulf %241, %242 : vector<4x256xf32>
    %244 = vector.extract_strided_slice %239 {offsets = [1, 0], sizes = [1, 256], strides = [1, 1]} : vector<4x256xf32> to vector<1x256xf32>
    %245 = vector.broadcast %20 : vector<4x1xf32> to vector<4x256xf32>
    %246 = vector.broadcast %244 : vector<1x256xf32> to vector<4x256xf32>
    %247 = arith.mulf %245, %246 : vector<4x256xf32>
    %248 = arith.addf %243, %247 : vector<4x256xf32>
    %249 = vector.extract_strided_slice %239 {offsets = [2, 0], sizes = [1, 256], strides = [1, 1]} : vector<4x256xf32> to vector<1x256xf32>
    %250 = vector.broadcast %23 : vector<4x1xf32> to vector<4x256xf32>
    %251 = vector.broadcast %249 : vector<1x256xf32> to vector<4x256xf32>
    %252 = arith.mulf %250, %251 : vector<4x256xf32>
    %253 = arith.addf %248, %252 : vector<4x256xf32>
    %254 = vector.extract_strided_slice %239 {offsets = [3, 0], sizes = [1, 256], strides = [1, 1]} : vector<4x256xf32> to vector<1x256xf32>
    %255 = vector.broadcast %26 : vector<4x1xf32> to vector<4x256xf32>
    %256 = vector.broadcast %254 : vector<1x256xf32> to vector<4x256xf32>
    %257 = arith.mulf %255, %256 : vector<4x256xf32>
    %258 = arith.addf %253, %257 : vector<4x256xf32>
    %c16_i32_215 = arith.constant 16 : i32
    %259 = tpu.dynamic_rotate %234 by %c16_i32_215 dim 1 : vector<4x256xf32>, i32 -> vector<4x256xf32>
    %cst_216 = arith.constant 0.000000e+00 : f32
    %260 = vector.shape_cast %4 : vector<1x256xi1> to vector<1x256xi1>
    %261 = vector.broadcast %260 : vector<1x256xi1> to vector<4x256xi1>
    %262 = vector.broadcast %cst_216 : f32 to vector<4x256xf32>
    %263 = arith.select %261, %259, %262 : vector<4x256xi1>, vector<4x256xf32>
    %264 = vector.extract_strided_slice %263 {offsets = [0, 0], sizes = [1, 256], strides = [1, 1]} : vector<4x256xf32> to vector<1x256xf32>
    %265 = vector.broadcast %29 : vector<4x1xf32> to vector<4x256xf32>
    %266 = vector.broadcast %264 : vector<1x256xf32> to vector<4x256xf32>
    %267 = arith.mulf %265, %266 : vector<4x256xf32>
    %268 = arith.addf %258, %267 : vector<4x256xf32>
    %269 = vector.extract_strided_slice %263 {offsets = [1, 0], sizes = [1, 256], strides = [1, 1]} : vector<4x256xf32> to vector<1x256xf32>
    %270 = vector.broadcast %32 : vector<4x1xf32> to vector<4x256xf32>
    %271 = vector.broadcast %269 : vector<1x256xf32> to vector<4x256xf32>
    %272 = arith.mulf %270, %271 : vector<4x256xf32>
    %273 = arith.addf %268, %272 : vector<4x256xf32>
    %274 = vector.extract_strided_slice %263 {offsets = [2, 0], sizes = [1, 256], strides = [1, 1]} : vector<4x256xf32> to vector<1x256xf32>
    %275 = vector.broadcast %35 : vector<4x1xf32> to vector<4x256xf32>
    %276 = vector.broadcast %274 : vector<1x256xf32> to vector<4x256xf32>
    %277 = arith.mulf %275, %276 : vector<4x256xf32>
    %278 = arith.addf %273, %277 : vector<4x256xf32>
    %279 = vector.extract_strided_slice %263 {offsets = [3, 0], sizes = [1, 256], strides = [1, 1]} : vector<4x256xf32> to vector<1x256xf32>
    %280 = vector.broadcast %38 : vector<4x1xf32> to vector<4x256xf32>
    %281 = vector.broadcast %279 : vector<1x256xf32> to vector<4x256xf32>
    %282 = arith.mulf %280, %281 : vector<4x256xf32>
    %283 = arith.addf %278, %282 : vector<4x256xf32>
    %c15_i32_217 = arith.constant 15 : i32
    %284 = tpu.dynamic_rotate %234 by %c15_i32_217 dim 1 : vector<4x256xf32>, i32 -> vector<4x256xf32>
    %cst_218 = arith.constant 0.000000e+00 : f32
    %285 = vector.shape_cast %12 : vector<1x256xi1> to vector<1x256xi1>
    %286 = vector.broadcast %285 : vector<1x256xi1> to vector<4x256xi1>
    %287 = vector.broadcast %cst_218 : f32 to vector<4x256xf32>
    %288 = arith.select %286, %284, %287 : vector<4x256xi1>, vector<4x256xf32>
    %289 = vector.extract_strided_slice %288 {offsets = [0, 0], sizes = [1, 256], strides = [1, 1]} : vector<4x256xf32> to vector<1x256xf32>
    %290 = vector.broadcast %41 : vector<4x1xf32> to vector<4x256xf32>
    %291 = vector.broadcast %289 : vector<1x256xf32> to vector<4x256xf32>
    %292 = arith.mulf %290, %291 : vector<4x256xf32>
    %293 = arith.addf %283, %292 : vector<4x256xf32>
    %294 = vector.extract_strided_slice %288 {offsets = [1, 0], sizes = [1, 256], strides = [1, 1]} : vector<4x256xf32> to vector<1x256xf32>
    %295 = vector.broadcast %44 : vector<4x1xf32> to vector<4x256xf32>
    %296 = vector.broadcast %294 : vector<1x256xf32> to vector<4x256xf32>
    %297 = arith.mulf %295, %296 : vector<4x256xf32>
    %298 = arith.addf %293, %297 : vector<4x256xf32>
    %299 = vector.extract_strided_slice %288 {offsets = [2, 0], sizes = [1, 256], strides = [1, 1]} : vector<4x256xf32> to vector<1x256xf32>
    %300 = vector.broadcast %47 : vector<4x1xf32> to vector<4x256xf32>
    %301 = vector.broadcast %299 : vector<1x256xf32> to vector<4x256xf32>
    %302 = arith.mulf %300, %301 : vector<4x256xf32>
    %303 = arith.addf %298, %302 : vector<4x256xf32>
    %304 = vector.extract_strided_slice %288 {offsets = [3, 0], sizes = [1, 256], strides = [1, 1]} : vector<4x256xf32> to vector<1x256xf32>
    %305 = vector.broadcast %50 : vector<4x1xf32> to vector<4x256xf32>
    %306 = vector.broadcast %304 : vector<1x256xf32> to vector<4x256xf32>
    %307 = arith.mulf %305, %306 : vector<4x256xf32>
    %308 = arith.addf %303, %307 : vector<4x256xf32>
    %c1_i32_219 = arith.constant 1 : i32
    %309 = tpu.dynamic_rotate %234 by %c1_i32_219 dim 1 : vector<4x256xf32>, i32 -> vector<4x256xf32>
    %cst_220 = arith.constant 0.000000e+00 : f32
    %310 = vector.shape_cast %8 : vector<1x256xi1> to vector<1x256xi1>
    %311 = vector.broadcast %310 : vector<1x256xi1> to vector<4x256xi1>
    %312 = vector.broadcast %cst_220 : f32 to vector<4x256xf32>
    %313 = arith.select %311, %309, %312 : vector<4x256xi1>, vector<4x256xf32>
    %314 = vector.extract_strided_slice %313 {offsets = [0, 0], sizes = [1, 256], strides = [1, 1]} : vector<4x256xf32> to vector<1x256xf32>
    %315 = vector.broadcast %53 : vector<4x1xf32> to vector<4x256xf32>
    %316 = vector.broadcast %314 : vector<1x256xf32> to vector<4x256xf32>
    %317 = arith.mulf %315, %316 : vector<4x256xf32>
    %318 = arith.addf %308, %317 : vector<4x256xf32>
    %319 = vector.extract_strided_slice %313 {offsets = [1, 0], sizes = [1, 256], strides = [1, 1]} : vector<4x256xf32> to vector<1x256xf32>
    %320 = vector.broadcast %56 : vector<4x1xf32> to vector<4x256xf32>
    %321 = vector.broadcast %319 : vector<1x256xf32> to vector<4x256xf32>
    %322 = arith.mulf %320, %321 : vector<4x256xf32>
    %323 = arith.addf %318, %322 : vector<4x256xf32>
    %324 = vector.extract_strided_slice %313 {offsets = [2, 0], sizes = [1, 256], strides = [1, 1]} : vector<4x256xf32> to vector<1x256xf32>
    %325 = vector.broadcast %59 : vector<4x1xf32> to vector<4x256xf32>
    %326 = vector.broadcast %324 : vector<1x256xf32> to vector<4x256xf32>
    %327 = arith.mulf %325, %326 : vector<4x256xf32>
    %328 = arith.addf %323, %327 : vector<4x256xf32>
    %329 = vector.extract_strided_slice %313 {offsets = [3, 0], sizes = [1, 256], strides = [1, 1]} : vector<4x256xf32> to vector<1x256xf32>
    %330 = vector.broadcast %62 : vector<4x1xf32> to vector<4x256xf32>
    %331 = vector.broadcast %329 : vector<1x256xf32> to vector<4x256xf32>
    %332 = arith.mulf %330, %331 : vector<4x256xf32>
    %333 = arith.addf %328, %332 : vector<4x256xf32>
    %334 = vector.extract_strided_slice %234 {offsets = [0, 0], sizes = [1, 256], strides = [1, 1]} : vector<4x256xf32> to vector<1x256xf32>
    %335 = vector.broadcast %65 : vector<4x1xf32> to vector<4x256xf32>
    %336 = vector.broadcast %334 : vector<1x256xf32> to vector<4x256xf32>
    %337 = arith.mulf %335, %336 : vector<4x256xf32>
    %338 = arith.addf %333, %337 : vector<4x256xf32>
    %339 = vector.extract_strided_slice %234 {offsets = [1, 0], sizes = [1, 256], strides = [1, 1]} : vector<4x256xf32> to vector<1x256xf32>
    %340 = vector.broadcast %68 : vector<4x1xf32> to vector<4x256xf32>
    %341 = vector.broadcast %339 : vector<1x256xf32> to vector<4x256xf32>
    %342 = arith.mulf %340, %341 : vector<4x256xf32>
    %343 = arith.addf %338, %342 : vector<4x256xf32>
    %344 = vector.extract_strided_slice %234 {offsets = [2, 0], sizes = [1, 256], strides = [1, 1]} : vector<4x256xf32> to vector<1x256xf32>
    %345 = vector.broadcast %71 : vector<4x1xf32> to vector<4x256xf32>
    %346 = vector.broadcast %344 : vector<1x256xf32> to vector<4x256xf32>
    %347 = arith.mulf %345, %346 : vector<4x256xf32>
    %348 = arith.addf %343, %347 : vector<4x256xf32>
    %349 = vector.extract_strided_slice %234 {offsets = [3, 0], sizes = [1, 256], strides = [1, 1]} : vector<4x256xf32> to vector<1x256xf32>
    %350 = vector.broadcast %74 : vector<4x1xf32> to vector<4x256xf32>
    %351 = vector.broadcast %349 : vector<1x256xf32> to vector<4x256xf32>
    %352 = arith.mulf %350, %351 : vector<4x256xf32>
    %353 = arith.addf %348, %352 : vector<4x256xf32>
    %c255_i32 = arith.constant 255 : i32
    %354 = tpu.dynamic_rotate %234 by %c255_i32 dim 1 : vector<4x256xf32>, i32 -> vector<4x256xf32>
    %cst_221 = arith.constant 0.000000e+00 : f32
    %355 = vector.shape_cast %10 : vector<1x256xi1> to vector<1x256xi1>
    %356 = vector.broadcast %355 : vector<1x256xi1> to vector<4x256xi1>
    %357 = vector.broadcast %cst_221 : f32 to vector<4x256xf32>
    %358 = arith.select %356, %354, %357 : vector<4x256xi1>, vector<4x256xf32>
    %359 = vector.extract_strided_slice %358 {offsets = [0, 0], sizes = [1, 256], strides = [1, 1]} : vector<4x256xf32> to vector<1x256xf32>
    %360 = vector.broadcast %77 : vector<4x1xf32> to vector<4x256xf32>
    %361 = vector.broadcast %359 : vector<1x256xf32> to vector<4x256xf32>
    %362 = arith.mulf %360, %361 : vector<4x256xf32>
    %363 = arith.addf %353, %362 : vector<4x256xf32>
    %364 = vector.extract_strided_slice %358 {offsets = [1, 0], sizes = [1, 256], strides = [1, 1]} : vector<4x256xf32> to vector<1x256xf32>
    %365 = vector.broadcast %80 : vector<4x1xf32> to vector<4x256xf32>
    %366 = vector.broadcast %364 : vector<1x256xf32> to vector<4x256xf32>
    %367 = arith.mulf %365, %366 : vector<4x256xf32>
    %368 = arith.addf %363, %367 : vector<4x256xf32>
    %369 = vector.extract_strided_slice %358 {offsets = [2, 0], sizes = [1, 256], strides = [1, 1]} : vector<4x256xf32> to vector<1x256xf32>
    %370 = vector.broadcast %83 : vector<4x1xf32> to vector<4x256xf32>
    %371 = vector.broadcast %369 : vector<1x256xf32> to vector<4x256xf32>
    %372 = arith.mulf %370, %371 : vector<4x256xf32>
    %373 = arith.addf %368, %372 : vector<4x256xf32>
    %374 = vector.extract_strided_slice %358 {offsets = [3, 0], sizes = [1, 256], strides = [1, 1]} : vector<4x256xf32> to vector<1x256xf32>
    %375 = vector.broadcast %86 : vector<4x1xf32> to vector<4x256xf32>
    %376 = vector.broadcast %374 : vector<1x256xf32> to vector<4x256xf32>
    %377 = arith.mulf %375, %376 : vector<4x256xf32>
    %378 = arith.addf %373, %377 : vector<4x256xf32>
    %c241_i32 = arith.constant 241 : i32
    %379 = tpu.dynamic_rotate %234 by %c241_i32 dim 1 : vector<4x256xf32>, i32 -> vector<4x256xf32>
    %cst_222 = arith.constant 0.000000e+00 : f32
    %380 = vector.shape_cast %13 : vector<1x256xi1> to vector<1x256xi1>
    %381 = vector.broadcast %380 : vector<1x256xi1> to vector<4x256xi1>
    %382 = vector.broadcast %cst_222 : f32 to vector<4x256xf32>
    %383 = arith.select %381, %379, %382 : vector<4x256xi1>, vector<4x256xf32>
    %384 = vector.extract_strided_slice %383 {offsets = [0, 0], sizes = [1, 256], strides = [1, 1]} : vector<4x256xf32> to vector<1x256xf32>
    %385 = vector.broadcast %89 : vector<4x1xf32> to vector<4x256xf32>
    %386 = vector.broadcast %384 : vector<1x256xf32> to vector<4x256xf32>
    %387 = arith.mulf %385, %386 : vector<4x256xf32>
    %388 = arith.addf %378, %387 : vector<4x256xf32>
    %389 = vector.extract_strided_slice %383 {offsets = [1, 0], sizes = [1, 256], strides = [1, 1]} : vector<4x256xf32> to vector<1x256xf32>
    %390 = vector.broadcast %92 : vector<4x1xf32> to vector<4x256xf32>
    %391 = vector.broadcast %389 : vector<1x256xf32> to vector<4x256xf32>
    %392 = arith.mulf %390, %391 : vector<4x256xf32>
    %393 = arith.addf %388, %392 : vector<4x256xf32>
    %394 = vector.extract_strided_slice %383 {offsets = [2, 0], sizes = [1, 256], strides = [1, 1]} : vector<4x256xf32> to vector<1x256xf32>
    %395 = vector.broadcast %95 : vector<4x1xf32> to vector<4x256xf32>
    %396 = vector.broadcast %394 : vector<1x256xf32> to vector<4x256xf32>
    %397 = arith.mulf %395, %396 : vector<4x256xf32>
    %398 = arith.addf %393, %397 : vector<4x256xf32>
    %399 = vector.extract_strided_slice %383 {offsets = [3, 0], sizes = [1, 256], strides = [1, 1]} : vector<4x256xf32> to vector<1x256xf32>
    %400 = vector.broadcast %98 : vector<4x1xf32> to vector<4x256xf32>
    %401 = vector.broadcast %399 : vector<1x256xf32> to vector<4x256xf32>
    %402 = arith.mulf %400, %401 : vector<4x256xf32>
    %403 = arith.addf %398, %402 : vector<4x256xf32>
    %c240_i32_223 = arith.constant 240 : i32
    %404 = tpu.dynamic_rotate %234 by %c240_i32_223 dim 1 : vector<4x256xf32>, i32 -> vector<4x256xf32>
    %cst_224 = arith.constant 0.000000e+00 : f32
    %405 = vector.shape_cast %6 : vector<1x256xi1> to vector<1x256xi1>
    %406 = vector.broadcast %405 : vector<1x256xi1> to vector<4x256xi1>
    %407 = vector.broadcast %cst_224 : f32 to vector<4x256xf32>
    %408 = arith.select %406, %404, %407 : vector<4x256xi1>, vector<4x256xf32>
    %409 = vector.extract_strided_slice %408 {offsets = [0, 0], sizes = [1, 256], strides = [1, 1]} : vector<4x256xf32> to vector<1x256xf32>
    %410 = vector.broadcast %101 : vector<4x1xf32> to vector<4x256xf32>
    %411 = vector.broadcast %409 : vector<1x256xf32> to vector<4x256xf32>
    %412 = arith.mulf %410, %411 : vector<4x256xf32>
    %413 = arith.addf %403, %412 : vector<4x256xf32>
    %414 = vector.extract_strided_slice %408 {offsets = [1, 0], sizes = [1, 256], strides = [1, 1]} : vector<4x256xf32> to vector<1x256xf32>
    %415 = vector.broadcast %104 : vector<4x1xf32> to vector<4x256xf32>
    %416 = vector.broadcast %414 : vector<1x256xf32> to vector<4x256xf32>
    %417 = arith.mulf %415, %416 : vector<4x256xf32>
    %418 = arith.addf %413, %417 : vector<4x256xf32>
    %419 = vector.extract_strided_slice %408 {offsets = [2, 0], sizes = [1, 256], strides = [1, 1]} : vector<4x256xf32> to vector<1x256xf32>
    %420 = vector.broadcast %107 : vector<4x1xf32> to vector<4x256xf32>
    %421 = vector.broadcast %419 : vector<1x256xf32> to vector<4x256xf32>
    %422 = arith.mulf %420, %421 : vector<4x256xf32>
    %423 = arith.addf %418, %422 : vector<4x256xf32>
    %424 = vector.extract_strided_slice %408 {offsets = [3, 0], sizes = [1, 256], strides = [1, 1]} : vector<4x256xf32> to vector<1x256xf32>
    %425 = vector.broadcast %110 : vector<4x1xf32> to vector<4x256xf32>
    %426 = vector.broadcast %424 : vector<1x256xf32> to vector<4x256xf32>
    %427 = arith.mulf %425, %426 : vector<4x256xf32>
    %428 = arith.addf %423, %427 : vector<4x256xf32>
    %c239_i32 = arith.constant 239 : i32
    %429 = tpu.dynamic_rotate %234 by %c239_i32 dim 1 : vector<4x256xf32>, i32 -> vector<4x256xf32>
    %cst_225 = arith.constant 0.000000e+00 : f32
    %430 = vector.shape_cast %14 : vector<1x256xi1> to vector<1x256xi1>
    %431 = vector.broadcast %430 : vector<1x256xi1> to vector<4x256xi1>
    %432 = vector.broadcast %cst_225 : f32 to vector<4x256xf32>
    %433 = arith.select %431, %429, %432 : vector<4x256xi1>, vector<4x256xf32>
    %434 = vector.extract_strided_slice %433 {offsets = [0, 0], sizes = [1, 256], strides = [1, 1]} : vector<4x256xf32> to vector<1x256xf32>
    %435 = vector.broadcast %113 : vector<4x1xf32> to vector<4x256xf32>
    %436 = vector.broadcast %434 : vector<1x256xf32> to vector<4x256xf32>
    %437 = arith.mulf %435, %436 : vector<4x256xf32>
    %438 = arith.addf %428, %437 : vector<4x256xf32>
    %439 = vector.extract_strided_slice %433 {offsets = [1, 0], sizes = [1, 256], strides = [1, 1]} : vector<4x256xf32> to vector<1x256xf32>
    %440 = vector.broadcast %116 : vector<4x1xf32> to vector<4x256xf32>
    %441 = vector.broadcast %439 : vector<1x256xf32> to vector<4x256xf32>
    %442 = arith.mulf %440, %441 : vector<4x256xf32>
    %443 = arith.addf %438, %442 : vector<4x256xf32>
    %444 = vector.extract_strided_slice %433 {offsets = [2, 0], sizes = [1, 256], strides = [1, 1]} : vector<4x256xf32> to vector<1x256xf32>
    %445 = vector.broadcast %119 : vector<4x1xf32> to vector<4x256xf32>
    %446 = vector.broadcast %444 : vector<1x256xf32> to vector<4x256xf32>
    %447 = arith.mulf %445, %446 : vector<4x256xf32>
    %448 = arith.addf %443, %447 : vector<4x256xf32>
    %449 = vector.extract_strided_slice %433 {offsets = [3, 0], sizes = [1, 256], strides = [1, 1]} : vector<4x256xf32> to vector<1x256xf32>
    %450 = vector.broadcast %122 : vector<4x1xf32> to vector<4x256xf32>
    %451 = vector.broadcast %449 : vector<1x256xf32> to vector<4x256xf32>
    %452 = arith.mulf %450, %451 : vector<4x256xf32>
    %453 = arith.addf %448, %452 : vector<4x256xf32>
    %454 = vector.broadcast %231 : vector<4x1xf32> to vector<4x256xf32>
    %455 = arith.addf %453, %454 : vector<4x256xf32>
    %cst_226 = arith.constant 0.000000e+00 : f32
    %456 = vector.broadcast %cst_226 : f32 to vector<4x256xf32>
    %457 = arith.maximumf %455, %456 : vector<4x256xf32>
    %c17_i32_227 = arith.constant 17 : i32
    %458 = tpu.dynamic_rotate %457 by %c17_i32_227 dim 1 : vector<4x256xf32>, i32 -> vector<4x256xf32>
    %cst_228 = arith.constant 0.000000e+00 : f32
    %459 = vector.shape_cast %11 : vector<1x256xi1> to vector<1x256xi1>
    %460 = vector.broadcast %459 : vector<1x256xi1> to vector<4x256xi1>
    %461 = vector.broadcast %cst_228 : f32 to vector<4x256xf32>
    %462 = arith.select %460, %458, %461 : vector<4x256xi1>, vector<4x256xf32>
    %463 = vector.extract_strided_slice %462 {offsets = [0, 0], sizes = [1, 256], strides = [1, 1]} : vector<4x256xf32> to vector<1x256xf32>
    %464 = vector.broadcast %125 : vector<4x1xf32> to vector<4x256xf32>
    %465 = vector.broadcast %463 : vector<1x256xf32> to vector<4x256xf32>
    %466 = arith.mulf %464, %465 : vector<4x256xf32>
    %467 = vector.extract_strided_slice %462 {offsets = [1, 0], sizes = [1, 256], strides = [1, 1]} : vector<4x256xf32> to vector<1x256xf32>
    %468 = vector.broadcast %128 : vector<4x1xf32> to vector<4x256xf32>
    %469 = vector.broadcast %467 : vector<1x256xf32> to vector<4x256xf32>
    %470 = arith.mulf %468, %469 : vector<4x256xf32>
    %471 = arith.addf %466, %470 : vector<4x256xf32>
    %472 = vector.extract_strided_slice %462 {offsets = [2, 0], sizes = [1, 256], strides = [1, 1]} : vector<4x256xf32> to vector<1x256xf32>
    %473 = vector.broadcast %131 : vector<4x1xf32> to vector<4x256xf32>
    %474 = vector.broadcast %472 : vector<1x256xf32> to vector<4x256xf32>
    %475 = arith.mulf %473, %474 : vector<4x256xf32>
    %476 = arith.addf %471, %475 : vector<4x256xf32>
    %477 = vector.extract_strided_slice %462 {offsets = [3, 0], sizes = [1, 256], strides = [1, 1]} : vector<4x256xf32> to vector<1x256xf32>
    %478 = vector.broadcast %134 : vector<4x1xf32> to vector<4x256xf32>
    %479 = vector.broadcast %477 : vector<1x256xf32> to vector<4x256xf32>
    %480 = arith.mulf %478, %479 : vector<4x256xf32>
    %481 = arith.addf %476, %480 : vector<4x256xf32>
    %c16_i32_229 = arith.constant 16 : i32
    %482 = tpu.dynamic_rotate %457 by %c16_i32_229 dim 1 : vector<4x256xf32>, i32 -> vector<4x256xf32>
    %cst_230 = arith.constant 0.000000e+00 : f32
    %483 = vector.shape_cast %4 : vector<1x256xi1> to vector<1x256xi1>
    %484 = vector.broadcast %483 : vector<1x256xi1> to vector<4x256xi1>
    %485 = vector.broadcast %cst_230 : f32 to vector<4x256xf32>
    %486 = arith.select %484, %482, %485 : vector<4x256xi1>, vector<4x256xf32>
    %487 = vector.extract_strided_slice %486 {offsets = [0, 0], sizes = [1, 256], strides = [1, 1]} : vector<4x256xf32> to vector<1x256xf32>
    %488 = vector.broadcast %137 : vector<4x1xf32> to vector<4x256xf32>
    %489 = vector.broadcast %487 : vector<1x256xf32> to vector<4x256xf32>
    %490 = arith.mulf %488, %489 : vector<4x256xf32>
    %491 = arith.addf %481, %490 : vector<4x256xf32>
    %492 = vector.extract_strided_slice %486 {offsets = [1, 0], sizes = [1, 256], strides = [1, 1]} : vector<4x256xf32> to vector<1x256xf32>
    %493 = vector.broadcast %140 : vector<4x1xf32> to vector<4x256xf32>
    %494 = vector.broadcast %492 : vector<1x256xf32> to vector<4x256xf32>
    %495 = arith.mulf %493, %494 : vector<4x256xf32>
    %496 = arith.addf %491, %495 : vector<4x256xf32>
    %497 = vector.extract_strided_slice %486 {offsets = [2, 0], sizes = [1, 256], strides = [1, 1]} : vector<4x256xf32> to vector<1x256xf32>
    %498 = vector.broadcast %143 : vector<4x1xf32> to vector<4x256xf32>
    %499 = vector.broadcast %497 : vector<1x256xf32> to vector<4x256xf32>
    %500 = arith.mulf %498, %499 : vector<4x256xf32>
    %501 = arith.addf %496, %500 : vector<4x256xf32>
    %502 = vector.extract_strided_slice %486 {offsets = [3, 0], sizes = [1, 256], strides = [1, 1]} : vector<4x256xf32> to vector<1x256xf32>
    %503 = vector.broadcast %146 : vector<4x1xf32> to vector<4x256xf32>
    %504 = vector.broadcast %502 : vector<1x256xf32> to vector<4x256xf32>
    %505 = arith.mulf %503, %504 : vector<4x256xf32>
    %506 = arith.addf %501, %505 : vector<4x256xf32>
    %c15_i32_231 = arith.constant 15 : i32
    %507 = tpu.dynamic_rotate %457 by %c15_i32_231 dim 1 : vector<4x256xf32>, i32 -> vector<4x256xf32>
    %cst_232 = arith.constant 0.000000e+00 : f32
    %508 = vector.shape_cast %12 : vector<1x256xi1> to vector<1x256xi1>
    %509 = vector.broadcast %508 : vector<1x256xi1> to vector<4x256xi1>
    %510 = vector.broadcast %cst_232 : f32 to vector<4x256xf32>
    %511 = arith.select %509, %507, %510 : vector<4x256xi1>, vector<4x256xf32>
    %512 = vector.extract_strided_slice %511 {offsets = [0, 0], sizes = [1, 256], strides = [1, 1]} : vector<4x256xf32> to vector<1x256xf32>
    %513 = vector.broadcast %149 : vector<4x1xf32> to vector<4x256xf32>
    %514 = vector.broadcast %512 : vector<1x256xf32> to vector<4x256xf32>
    %515 = arith.mulf %513, %514 : vector<4x256xf32>
    %516 = arith.addf %506, %515 : vector<4x256xf32>
    %517 = vector.extract_strided_slice %511 {offsets = [1, 0], sizes = [1, 256], strides = [1, 1]} : vector<4x256xf32> to vector<1x256xf32>
    %518 = vector.broadcast %152 : vector<4x1xf32> to vector<4x256xf32>
    %519 = vector.broadcast %517 : vector<1x256xf32> to vector<4x256xf32>
    %520 = arith.mulf %518, %519 : vector<4x256xf32>
    %521 = arith.addf %516, %520 : vector<4x256xf32>
    %522 = vector.extract_strided_slice %511 {offsets = [2, 0], sizes = [1, 256], strides = [1, 1]} : vector<4x256xf32> to vector<1x256xf32>
    %523 = vector.broadcast %155 : vector<4x1xf32> to vector<4x256xf32>
    %524 = vector.broadcast %522 : vector<1x256xf32> to vector<4x256xf32>
    %525 = arith.mulf %523, %524 : vector<4x256xf32>
    %526 = arith.addf %521, %525 : vector<4x256xf32>
    %527 = vector.extract_strided_slice %511 {offsets = [3, 0], sizes = [1, 256], strides = [1, 1]} : vector<4x256xf32> to vector<1x256xf32>
    %528 = vector.broadcast %158 : vector<4x1xf32> to vector<4x256xf32>
    %529 = vector.broadcast %527 : vector<1x256xf32> to vector<4x256xf32>
    %530 = arith.mulf %528, %529 : vector<4x256xf32>
    %531 = arith.addf %526, %530 : vector<4x256xf32>
    %c1_i32_233 = arith.constant 1 : i32
    %532 = tpu.dynamic_rotate %457 by %c1_i32_233 dim 1 : vector<4x256xf32>, i32 -> vector<4x256xf32>
    %cst_234 = arith.constant 0.000000e+00 : f32
    %533 = vector.shape_cast %8 : vector<1x256xi1> to vector<1x256xi1>
    %534 = vector.broadcast %533 : vector<1x256xi1> to vector<4x256xi1>
    %535 = vector.broadcast %cst_234 : f32 to vector<4x256xf32>
    %536 = arith.select %534, %532, %535 : vector<4x256xi1>, vector<4x256xf32>
    %537 = vector.extract_strided_slice %536 {offsets = [0, 0], sizes = [1, 256], strides = [1, 1]} : vector<4x256xf32> to vector<1x256xf32>
    %538 = vector.broadcast %161 : vector<4x1xf32> to vector<4x256xf32>
    %539 = vector.broadcast %537 : vector<1x256xf32> to vector<4x256xf32>
    %540 = arith.mulf %538, %539 : vector<4x256xf32>
    %541 = arith.addf %531, %540 : vector<4x256xf32>
    %542 = vector.extract_strided_slice %536 {offsets = [1, 0], sizes = [1, 256], strides = [1, 1]} : vector<4x256xf32> to vector<1x256xf32>
    %543 = vector.broadcast %164 : vector<4x1xf32> to vector<4x256xf32>
    %544 = vector.broadcast %542 : vector<1x256xf32> to vector<4x256xf32>
    %545 = arith.mulf %543, %544 : vector<4x256xf32>
    %546 = arith.addf %541, %545 : vector<4x256xf32>
    %547 = vector.extract_strided_slice %536 {offsets = [2, 0], sizes = [1, 256], strides = [1, 1]} : vector<4x256xf32> to vector<1x256xf32>
    %548 = vector.broadcast %167 : vector<4x1xf32> to vector<4x256xf32>
    %549 = vector.broadcast %547 : vector<1x256xf32> to vector<4x256xf32>
    %550 = arith.mulf %548, %549 : vector<4x256xf32>
    %551 = arith.addf %546, %550 : vector<4x256xf32>
    %552 = vector.extract_strided_slice %536 {offsets = [3, 0], sizes = [1, 256], strides = [1, 1]} : vector<4x256xf32> to vector<1x256xf32>
    %553 = vector.broadcast %170 : vector<4x1xf32> to vector<4x256xf32>
    %554 = vector.broadcast %552 : vector<1x256xf32> to vector<4x256xf32>
    %555 = arith.mulf %553, %554 : vector<4x256xf32>
    %556 = arith.addf %551, %555 : vector<4x256xf32>
    %557 = vector.extract_strided_slice %457 {offsets = [0, 0], sizes = [1, 256], strides = [1, 1]} : vector<4x256xf32> to vector<1x256xf32>
    %558 = vector.broadcast %173 : vector<4x1xf32> to vector<4x256xf32>
    %559 = vector.broadcast %557 : vector<1x256xf32> to vector<4x256xf32>
    %560 = arith.mulf %558, %559 : vector<4x256xf32>
    %561 = arith.addf %556, %560 : vector<4x256xf32>
    %562 = vector.extract_strided_slice %457 {offsets = [1, 0], sizes = [1, 256], strides = [1, 1]} : vector<4x256xf32> to vector<1x256xf32>
    %563 = vector.broadcast %176 : vector<4x1xf32> to vector<4x256xf32>
    %564 = vector.broadcast %562 : vector<1x256xf32> to vector<4x256xf32>
    %565 = arith.mulf %563, %564 : vector<4x256xf32>
    %566 = arith.addf %561, %565 : vector<4x256xf32>
    %567 = vector.extract_strided_slice %457 {offsets = [2, 0], sizes = [1, 256], strides = [1, 1]} : vector<4x256xf32> to vector<1x256xf32>
    %568 = vector.broadcast %179 : vector<4x1xf32> to vector<4x256xf32>
    %569 = vector.broadcast %567 : vector<1x256xf32> to vector<4x256xf32>
    %570 = arith.mulf %568, %569 : vector<4x256xf32>
    %571 = arith.addf %566, %570 : vector<4x256xf32>
    %572 = vector.extract_strided_slice %457 {offsets = [3, 0], sizes = [1, 256], strides = [1, 1]} : vector<4x256xf32> to vector<1x256xf32>
    %573 = vector.broadcast %182 : vector<4x1xf32> to vector<4x256xf32>
    %574 = vector.broadcast %572 : vector<1x256xf32> to vector<4x256xf32>
    %575 = arith.mulf %573, %574 : vector<4x256xf32>
    %576 = arith.addf %571, %575 : vector<4x256xf32>
    %c255_i32_235 = arith.constant 255 : i32
    %577 = tpu.dynamic_rotate %457 by %c255_i32_235 dim 1 : vector<4x256xf32>, i32 -> vector<4x256xf32>
    %cst_236 = arith.constant 0.000000e+00 : f32
    %578 = vector.shape_cast %10 : vector<1x256xi1> to vector<1x256xi1>
    %579 = vector.broadcast %578 : vector<1x256xi1> to vector<4x256xi1>
    %580 = vector.broadcast %cst_236 : f32 to vector<4x256xf32>
    %581 = arith.select %579, %577, %580 : vector<4x256xi1>, vector<4x256xf32>
    %582 = vector.extract_strided_slice %581 {offsets = [0, 0], sizes = [1, 256], strides = [1, 1]} : vector<4x256xf32> to vector<1x256xf32>
    %583 = vector.broadcast %185 : vector<4x1xf32> to vector<4x256xf32>
    %584 = vector.broadcast %582 : vector<1x256xf32> to vector<4x256xf32>
    %585 = arith.mulf %583, %584 : vector<4x256xf32>
    %586 = arith.addf %576, %585 : vector<4x256xf32>
    %587 = vector.extract_strided_slice %581 {offsets = [1, 0], sizes = [1, 256], strides = [1, 1]} : vector<4x256xf32> to vector<1x256xf32>
    %588 = vector.broadcast %188 : vector<4x1xf32> to vector<4x256xf32>
    %589 = vector.broadcast %587 : vector<1x256xf32> to vector<4x256xf32>
    %590 = arith.mulf %588, %589 : vector<4x256xf32>
    %591 = arith.addf %586, %590 : vector<4x256xf32>
    %592 = vector.extract_strided_slice %581 {offsets = [2, 0], sizes = [1, 256], strides = [1, 1]} : vector<4x256xf32> to vector<1x256xf32>
    %593 = vector.broadcast %191 : vector<4x1xf32> to vector<4x256xf32>
    %594 = vector.broadcast %592 : vector<1x256xf32> to vector<4x256xf32>
    %595 = arith.mulf %593, %594 : vector<4x256xf32>
    %596 = arith.addf %591, %595 : vector<4x256xf32>
    %597 = vector.extract_strided_slice %581 {offsets = [3, 0], sizes = [1, 256], strides = [1, 1]} : vector<4x256xf32> to vector<1x256xf32>
    %598 = vector.broadcast %194 : vector<4x1xf32> to vector<4x256xf32>
    %599 = vector.broadcast %597 : vector<1x256xf32> to vector<4x256xf32>
    %600 = arith.mulf %598, %599 : vector<4x256xf32>
    %601 = arith.addf %596, %600 : vector<4x256xf32>
    %c241_i32_237 = arith.constant 241 : i32
    %602 = tpu.dynamic_rotate %457 by %c241_i32_237 dim 1 : vector<4x256xf32>, i32 -> vector<4x256xf32>
    %cst_238 = arith.constant 0.000000e+00 : f32
    %603 = vector.shape_cast %13 : vector<1x256xi1> to vector<1x256xi1>
    %604 = vector.broadcast %603 : vector<1x256xi1> to vector<4x256xi1>
    %605 = vector.broadcast %cst_238 : f32 to vector<4x256xf32>
    %606 = arith.select %604, %602, %605 : vector<4x256xi1>, vector<4x256xf32>
    %607 = vector.extract_strided_slice %606 {offsets = [0, 0], sizes = [1, 256], strides = [1, 1]} : vector<4x256xf32> to vector<1x256xf32>
    %608 = vector.broadcast %197 : vector<4x1xf32> to vector<4x256xf32>
    %609 = vector.broadcast %607 : vector<1x256xf32> to vector<4x256xf32>
    %610 = arith.mulf %608, %609 : vector<4x256xf32>
    %611 = arith.addf %601, %610 : vector<4x256xf32>
    %612 = vector.extract_strided_slice %606 {offsets = [1, 0], sizes = [1, 256], strides = [1, 1]} : vector<4x256xf32> to vector<1x256xf32>
    %613 = vector.broadcast %200 : vector<4x1xf32> to vector<4x256xf32>
    %614 = vector.broadcast %612 : vector<1x256xf32> to vector<4x256xf32>
    %615 = arith.mulf %613, %614 : vector<4x256xf32>
    %616 = arith.addf %611, %615 : vector<4x256xf32>
    %617 = vector.extract_strided_slice %606 {offsets = [2, 0], sizes = [1, 256], strides = [1, 1]} : vector<4x256xf32> to vector<1x256xf32>
    %618 = vector.broadcast %203 : vector<4x1xf32> to vector<4x256xf32>
    %619 = vector.broadcast %617 : vector<1x256xf32> to vector<4x256xf32>
    %620 = arith.mulf %618, %619 : vector<4x256xf32>
    %621 = arith.addf %616, %620 : vector<4x256xf32>
    %622 = vector.extract_strided_slice %606 {offsets = [3, 0], sizes = [1, 256], strides = [1, 1]} : vector<4x256xf32> to vector<1x256xf32>
    %623 = vector.broadcast %206 : vector<4x1xf32> to vector<4x256xf32>
    %624 = vector.broadcast %622 : vector<1x256xf32> to vector<4x256xf32>
    %625 = arith.mulf %623, %624 : vector<4x256xf32>
    %626 = arith.addf %621, %625 : vector<4x256xf32>
    %c240_i32_239 = arith.constant 240 : i32
    %627 = tpu.dynamic_rotate %457 by %c240_i32_239 dim 1 : vector<4x256xf32>, i32 -> vector<4x256xf32>
    %cst_240 = arith.constant 0.000000e+00 : f32
    %628 = vector.shape_cast %6 : vector<1x256xi1> to vector<1x256xi1>
    %629 = vector.broadcast %628 : vector<1x256xi1> to vector<4x256xi1>
    %630 = vector.broadcast %cst_240 : f32 to vector<4x256xf32>
    %631 = arith.select %629, %627, %630 : vector<4x256xi1>, vector<4x256xf32>
    %632 = vector.extract_strided_slice %631 {offsets = [0, 0], sizes = [1, 256], strides = [1, 1]} : vector<4x256xf32> to vector<1x256xf32>
    %633 = vector.broadcast %209 : vector<4x1xf32> to vector<4x256xf32>
    %634 = vector.broadcast %632 : vector<1x256xf32> to vector<4x256xf32>
    %635 = arith.mulf %633, %634 : vector<4x256xf32>
    %636 = arith.addf %626, %635 : vector<4x256xf32>
    %637 = vector.extract_strided_slice %631 {offsets = [1, 0], sizes = [1, 256], strides = [1, 1]} : vector<4x256xf32> to vector<1x256xf32>
    %638 = vector.broadcast %212 : vector<4x1xf32> to vector<4x256xf32>
    %639 = vector.broadcast %637 : vector<1x256xf32> to vector<4x256xf32>
    %640 = arith.mulf %638, %639 : vector<4x256xf32>
    %641 = arith.addf %636, %640 : vector<4x256xf32>
    %642 = vector.extract_strided_slice %631 {offsets = [2, 0], sizes = [1, 256], strides = [1, 1]} : vector<4x256xf32> to vector<1x256xf32>
    %643 = vector.broadcast %215 : vector<4x1xf32> to vector<4x256xf32>
    %644 = vector.broadcast %642 : vector<1x256xf32> to vector<4x256xf32>
    %645 = arith.mulf %643, %644 : vector<4x256xf32>
    %646 = arith.addf %641, %645 : vector<4x256xf32>
    %647 = vector.extract_strided_slice %631 {offsets = [3, 0], sizes = [1, 256], strides = [1, 1]} : vector<4x256xf32> to vector<1x256xf32>
    %648 = vector.broadcast %218 : vector<4x1xf32> to vector<4x256xf32>
    %649 = vector.broadcast %647 : vector<1x256xf32> to vector<4x256xf32>
    %650 = arith.mulf %648, %649 : vector<4x256xf32>
    %651 = arith.addf %646, %650 : vector<4x256xf32>
    %c239_i32_241 = arith.constant 239 : i32
    %652 = tpu.dynamic_rotate %457 by %c239_i32_241 dim 1 : vector<4x256xf32>, i32 -> vector<4x256xf32>
    %cst_242 = arith.constant 0.000000e+00 : f32
    %653 = vector.shape_cast %14 : vector<1x256xi1> to vector<1x256xi1>
    %654 = vector.broadcast %653 : vector<1x256xi1> to vector<4x256xi1>
    %655 = vector.broadcast %cst_242 : f32 to vector<4x256xf32>
    %656 = arith.select %654, %652, %655 : vector<4x256xi1>, vector<4x256xf32>
    %657 = vector.extract_strided_slice %656 {offsets = [0, 0], sizes = [1, 256], strides = [1, 1]} : vector<4x256xf32> to vector<1x256xf32>
    %658 = vector.broadcast %221 : vector<4x1xf32> to vector<4x256xf32>
    %659 = vector.broadcast %657 : vector<1x256xf32> to vector<4x256xf32>
    %660 = arith.mulf %658, %659 : vector<4x256xf32>
    %661 = arith.addf %651, %660 : vector<4x256xf32>
    %662 = vector.extract_strided_slice %656 {offsets = [1, 0], sizes = [1, 256], strides = [1, 1]} : vector<4x256xf32> to vector<1x256xf32>
    %663 = vector.broadcast %224 : vector<4x1xf32> to vector<4x256xf32>
    %664 = vector.broadcast %662 : vector<1x256xf32> to vector<4x256xf32>
    %665 = arith.mulf %663, %664 : vector<4x256xf32>
    %666 = arith.addf %661, %665 : vector<4x256xf32>
    %667 = vector.extract_strided_slice %656 {offsets = [2, 0], sizes = [1, 256], strides = [1, 1]} : vector<4x256xf32> to vector<1x256xf32>
    %668 = vector.broadcast %227 : vector<4x1xf32> to vector<4x256xf32>
    %669 = vector.broadcast %667 : vector<1x256xf32> to vector<4x256xf32>
    %670 = arith.mulf %668, %669 : vector<4x256xf32>
    %671 = arith.addf %666, %670 : vector<4x256xf32>
    %672 = vector.extract_strided_slice %656 {offsets = [3, 0], sizes = [1, 256], strides = [1, 1]} : vector<4x256xf32> to vector<1x256xf32>
    %673 = vector.broadcast %230 : vector<4x1xf32> to vector<4x256xf32>
    %674 = vector.broadcast %672 : vector<1x256xf32> to vector<4x256xf32>
    %675 = arith.mulf %673, %674 : vector<4x256xf32>
    %676 = arith.addf %671, %675 : vector<4x256xf32>
    %677 = vector.broadcast %232 : vector<4x1xf32> to vector<4x256xf32>
    %678 = arith.addf %676, %677 : vector<4x256xf32>
    %679 = arith.addf %678, %234 : vector<4x256xf32>
    %cst_243 = arith.constant 0.000000e+00 : f32
    %680 = vector.broadcast %cst_243 : f32 to vector<4x256xf32>
    %681 = arith.maximumf %679, %680 : vector<4x256xf32>
    %c0_244 = arith.constant 0 : index
    %c0_245 = arith.constant 0 : index
    %c0_246 = arith.constant 0 : index
    %682 = vector.load %arg6[%c0_244, %c0_245, %c0_246] : memref<1x4x256xf32, #tpu.memory_space<vmem>>, vector<1x4x256xf32>
    %683 = vector.shape_cast %682 : vector<1x4x256xf32> to vector<4x256xf32>
    %684 = vector.shape_cast %681 : vector<4x256xf32> to vector<1x4x256xf32>
    tpu.vector_store %arg6[%c0_244, %c0_245, %c0_246], %684 {strides = array<i32>} : memref<1x4x256xf32, #tpu.memory_space<vmem>>, vector<1x4x256xf32>,
    return
  }
  func.func @transform_0(%arg0: i32) -> (i32, i32, i32) {
    %c0_i32 = arith.constant 0 : i32
    %c0_i32_0 = arith.constant 0 : i32
    %c0_i32_1 = arith.constant 0 : i32
    return %arg0, %c0_i32, %c0_i32_0 : i32, i32, i32
  }
  func.func @transform_1(%arg0: i32) -> (i32, i32, i32) {
    %c0_i32 = arith.constant 0 : i32
    %c0_i32_0 = arith.constant 0 : i32
    %c0_i32_1 = arith.constant 0 : i32
    %c0_i32_2 = arith.constant 0 : i32
    return %c0_i32, %c0_i32_0, %c0_i32_1 : i32, i32, i32
  }
  func.func @transform_2(%arg0: i32) -> (i32, i32) {
    %c0_i32 = arith.constant 0 : i32
    %c0_i32_0 = arith.constant 0 : i32
    %c0_i32_1 = arith.constant 0 : i32
    return %c0_i32, %c0_i32_0 : i32, i32
  }
  func.func @transform_3(%arg0: i32) -> (i32, i32, i32) {
    %c0_i32 = arith.constant 0 : i32
    %c0_i32_0 = arith.constant 0 : i32
    %c0_i32_1 = arith.constant 0 : i32
    %c0_i32_2 = arith.constant 0 : i32
    return %c0_i32, %c0_i32_0, %c0_i32_1 : i32, i32, i32
  }
  func.func @transform_4(%arg0: i32) -> (i32, i32) {
    %c0_i32 = arith.constant 0 : i32
    %c0_i32_0 = arith.constant 0 : i32
    %c0_i32_1 = arith.constant 0 : i32
    return %c0_i32, %c0_i32_0 : i32, i32
  }
  func.func @transform_5(%arg0: i32) -> (i32, i32, i32) {
    %c0_i32 = arith.constant 0 : i32
    %c0_i32_0 = arith.constant 0 : i32
    %c0_i32_1 = arith.constant 0 : i32
    return %arg0, %c0_i32, %c0_i32_0 : i32, i32, i32
  }
}

</mosaic_0001>

<bundles_post_ra>
// kernel: tpu_custom_call.1
= control target key start
LH: loop header
LB: loop body
LE: loop exit
PB: predicated region body
PF: predicated region fallthrough
CT: control target
= control target key end

     0   :  { %10 = vsyncpa [#allocation3], 0  ;;  %s2819_s0 = inlined_call_operand.vmem [shape: f32[2,4,256], index: 0, kind: input, shape index: {}]   ;;  %s2820_s1 = inlined_call_operand.vmem [shape: f32[9,4,4], index: 1, kind: input, shape index: {}]   ;;  %s2821_s2 = inlined_call_operand.vmem [shape: f32[4,1], index: 2, kind: input, shape index: {}]   ;;  %s2822_s3 = inlined_call_operand.vmem [shape: f32[9,4,4], index: 3, kind: input, shape index: {}]   ;;  %s2823_s4 = inlined_call_operand.vmem [shape: f32[4,1], index: 4, kind: input, shape index: {}]   ;;  %s2824_s5 = inlined_call_operand.hbm [shape: f32[2,4,256], index: 5, kind: output, shape index: {}]  }
   0x1   :  { %12 = vsyncpa [#allocation3 + $0x1], 0  ;;  %s2011_s18 = smov 0   ;;  %s2013_s19 = smov 0  }
   0x2   :  { %s2015_s20 = smov 0   ;;  %s2017_s21 = smov 0  }
   0x3 LB: > { %s2032_s22 = sadd.s32 4294967295, %s1966_s21   ;;  %s1757_s23 = sadd.s32 4294967294, %s1966_s21   ;;  %s1966_s21 = sphi %s2017_s21, %s2852_s21   ;;  %s1962_s20 = sphi %s2015_s20, %s2851_s20   ;;  %s1958_s19 = sphi %s2013_s19, %s2850_s19   ;;  %s1954_s18 = sphi %s2011_s18, %s2849_s18  }
   0x4   : > { %s2036_s24 = sadd.s32 1, %s1966_s21   ;;  %s135_s25 = sadd.s32 1, %s1962_s20 }
   0x5   : > { %s132_s26 = ssub.s32 %s1966_s21, %s2036_s24  ;;  %p145_p0 = scmp.ne.s32.totalorder %s1962_s20, %s1958_s19 }
   0x6   : > { %p133_p1 = scmp.eq.s32.totalorder %s132_s26, 0  ;;  %p146_p2 = scmp.eq.s32.totalorder %s2032_s22, 1 }
   0x7   : > { %p151_p3 = scmp.ne.s32.totalorder %s1958_s19, %s1954_s18  ;;  %p152_p4 = scmp.eq.s32.totalorder %s1757_s23, 1 }
   0x8   : > { %s2047_s27 = scalar_select %p133_p1, %s1962_s20, %s135_s25  }
   0x9   : > { %p2049_p5 = por %p146_p2, %p145_p0  ;;  %p2053_p6 = por %p152_p4, %p151_p3 }
   0xa   : > { %p1760_p7 = scmp.ge.s32.totalorder %s1966_s21, 1  ;;  %p190_p8 = scmp.lt.s32.totalorder %s1966_s21, 3 }
   0xc   : > { %p191_p9 = pnand %p1760_p7, %p190_p8 }
   0xd   : > { %v244_v0 = vld [vmem:[%s2820_s1] sm:$0xf] (!%p191_p9)  ;;  %p218_p10 = scmp.lt.s32.totalorder (!%p191_p9), %s2032_s22, 1  ;;  %v1968_v1 = vmov (!%p191_p9), 0   ;;  %v1969_v2 = vmov (!%p191_p9), 1   ;;  %s1970_s12 = smov (!%p191_p9), 17   ;;  %v223_v24 = vlaneseq (!%p191_p9) }
   0xe   : > { %194 = sbr.rel (%p191_p9) target bundleno = 540 (0x21c), region = 40  ;;  %1838 = vset.pattern.permute.xlu1 (!%p191_p9), %v1968_v1  ;;  %1844 = vset.pattern.permute.xlu0 (!%p191_p9), %v1968_v1  ;;  %v1971_v5 = vmov (!%p191_p9), 3   ;;  %s1972_s13 = smov (!%p191_p9), 16   ;;  %v1764_v6 = vld [vmem:[%s2820_s1 + $0x4] sm:$0xf] (!%p191_p9)  ;;  %v1974_v8 = vmov (!%p191_p9), 2  }
   0xf   : > { %299 = vperm.xlu1 (!%p191_p9), %1838, %v244_v0   ;;  %s1973_s16 = smov (!%p191_p9), 15   ;;  %v1765_v7 = vld [vmem:[%s2820_s1 + $0x8] sm:$0xf] (!%p191_p9)  ;;  %v1766_v9 = vld [vmem:[%s2820_s1 + $0xc] sm:$0xf] (!%p191_p9)  ;;  %s1977_s14 = smov (!%p191_p9), 113  }
  0x10   : > { %v1767_v10 = vld [vmem:[%s2820_s1 + $0x10] sm:$0xf] (!%p191_p9)  ;;  %v1768_v11 = vld [vmem:[%s2820_s1 + $0x14] sm:$0xf] (!%p191_p9)  ;;  %v1769_v12 = vld [vmem:[%s2820_s1 + $0x18] sm:$0xf] (!%p191_p9) }
  0x11   : > { %s1978_s23 = smov (!%p191_p9), 112   ;;  %v1770_v13 = vld [vmem:[%s2820_s1 + $0x1c] sm:$0xf] (!%p191_p9)  ;;  %v1771_v14 = vld [vmem:[%s2820_s1 + $0x20] sm:$0xf] (!%p191_p9)  ;;  %s1979_s15 = smov (!%p191_p9), 111  }
  0x12   : > { %v2152_v15 = vld [vmem:[%s2822_s3] sm:$0xf] (!%p191_p9)  ;;  %v2159_v16 = vld [vmem:[%s2822_s3 + $0x4] sm:$0xf] (!%p191_p9)  ;;  %v2168_v17 = vld [vmem:[%s2822_s3 + $0x8] sm:$0xf] (!%p191_p9) }
  0x13   : > { %1839 = vset.pattern.permute.xlu1 (!%p191_p9), %v1969_v2  ;;  %v2175_v18 = vld [vmem:[%s2822_s3 + $0xc] sm:$0xf] (!%p191_p9)  ;;  %v2183_v19 = vld [vmem:[%s2822_s3 + $0x10] sm:$0xf] (!%p191_p9)  ;;  %v2201_v27 = vand.u32 (!%p191_p9), 127, %v223_v24  ;;  %v2222_v36 = vshrl.u32 (!%p191_p9), %v223_v24, 7 }
  0x14   : > { %313 = vperm.xlu1 (!%p191_p9), %1839, %v244_v0   ;;  %v278_v29 = vld [vmem:[%s2821_s2] sm:$0xf] (!%p191_p9)  ;;  %s215_s9 = sand.u32 (!%p191_p9), 1, %s1958_s19  }
  0x15   : > { %s219_s7 = scalar_select %p218_p10, %s2032_s22, 1  ;;  %v2207_v30 = vadd.s32 128, %v2201_v27  ;;  %v226_v32 = vand.u32 15, %v2201_v27  ;;  %vm228_vm0 = vcmp.ge.s32.totalorder %v2201_v27, 16  ;;  %vm288_vm2 = vcmp.lt.s32.totalorder %v2201_v27, 17 }
  0x16   : > { %v2245_v42 = vsub.s32 1, %v2222_v36  ;;  %v2250_v44 = vsub.s32 0, %v2222_v36  ;;  %vm364_vm5 = vcmp.lt.s32.totalorder %v2201_v27, 16  ;;  %v2268_v53 = vsub.s32 2, %v2222_v36  ;;  %s1761_s10 = sshll.u32 %s215_s9, 3 }
  0x17   : > { %s1785_s8 = sshll.u32 %s219_s7, 3  ;;  %s1975_s7 = smov 1   ;;  %v227_v34 = vand.u32 15, %v2207_v30  ;;  %vm2217_vm1 = vcmp.ge.s32.totalorder %v226_v32, 1  ;;  %v2273_v57 = vsub.s32 3, %v2222_v36  ;;  %vm2291_vm6 = vcmp.lt.s32.totalorder %v226_v32, 15 }
  0x18   : > { %s2069_s11 = scalar_lea.vmem %s2819_s0, %s1785_s8  ;;  %1840 = vset.pattern.permute.xlu1 %v1971_v5  ;;  %s1976_s8 = smov 127   ;;  %vm2236_vm4 = vmand %vm228_vm0, %vm2217_vm1  ;;  %vm442_vm7 = vcmp.lt.s32.totalorder %v2201_v27, 15  ;;  %vm520_vm10 = vcmp.lt.s32.totalorder %v2201_v27, 1  ;;  %vm703_vm11 = vcmp.lt.s32.totalorder %v2201_v27, 127  ;;  %vm231_vm12 = vcmp.lt.s32.totalorder %v2207_v30, 240 }
  0x19   : > { %v2073_v3 = vld [vmem:[%s2069_s11] sm:$0xff]  ;;  %345 = vperm.xlu1 %1840, %v244_v0   ;;  %vm2228_vm3 = vcmp.ge.s32.totalorder %v227_v34, 1  ;;  %vm2302_vm8 = vcmp.lt.s32.totalorder %v227_v34, 15  ;;  %vm2310_vm9 = vmand %vm228_vm0, %vm2291_vm6  ;;  %vm2826_vm13 = vcmp.lt.s32.totalorder %v2201_v27, 113  ;;  %vm2825_vm15 = vcmp.lt.s32.totalorder %v2201_v27, 112  ;;  %s217_s17 = scalar_lea.vmem [#allocation2], %s1761_s10 }
  0x1a   : > { %284 = vrot.lane.b32.xlu0 %v2073_v3, %s1970_s12  ;;  %v2079_v4 = vcombine.high %v2073_v3, %v2073_v3  ;;  %vm2437_vm14 = vmand %vm231_vm12, %vm2228_vm3  ;;  %s1698_s25 = sshll.u32 %s217_s17, 4  ;;  %s2779_s25 = int_to_ptr.vmem [resolvable:$true] %s1698_s25 }
  0x1d   : > { %360 = vrot.lane.b32.xlu1 %v2073_v3, %s1972_s13 }
  0x1e   : > { %286 = vrot.lane.b32.xlu0 %v2079_v4, %s1970_s12  ;;  %1841 = vset.pattern.permute.xlu1 %v1968_v1 }
  0x21   : > { %375 = vperm.xlu1 %1841, %v1764_v6  }
  0x22   : > { %362 = vrot.lane.b32.xlu0 %v2079_v4, %s1972_s13 }
  0x25   : > { %1842 = vset.pattern.permute.xlu1 %v1974_v8 }
  0x26   : > { %438 = vrot.lane.b32.xlu0 %v2073_v3, %s1973_s16  ;;  %407 = vperm.xlu1 %1842, %v1764_v6  }
  0x2a   : > { %453 = vperm.xlu0 %1844, %v1765_v7   ;;  %1843 = vset.pattern.permute.xlu1 %v1971_v5 }
  0x2b   : > { %423 = vperm.xlu1 %1843, %v1764_v6  }
  0x2e   : > { %1847 = vset.pattern.permute.xlu0 %v1971_v5 }
  0x2f   : > { %501 = vperm.xlu0 %1847, %v1765_v7   ;;  %440 = vrot.lane.b32.xlu1 %v2079_v4, %s1973_s16 }
  0x30   : > { %1845 = vset.pattern.permute.xlu1 %v1969_v2 }
  0x33   : > { %579 = vperm.xlu0 %1847, %v1766_v9   ;;  %469 = vperm.xlu1 %1845, %v1765_v7  }
  0x37   : > { %1850 = vset.pattern.permute.xlu0 %v1974_v8  ;;  %1846 = vset.pattern.permute.xlu1 %v1974_v8 }
  0x38   : > { %329 = vperm.xlu0 %1850, %v244_v0   ;;  %485 = vperm.xlu1 %1846, %v1765_v7  }
  0x3c   : > { %648 = vperm.xlu0 %1850, %v1767_v10   ;;  %516 = vrot.lane.b32.xlu1 %v2073_v3, %s1975_s7 }
  0x3d   : > { %1848 = vset.pattern.permute.xlu1 %v1969_v2 }
  0x40   : > { %1853 = vset.pattern.permute.xlu0 %v1969_v2  ;;  %518 = vrot.lane.b32.xlu1 %v2079_v4, %s1975_s7 }
  0x41   : > { %391 = vperm.xlu0 %1853, %v1764_v6  }
  0x44   : > { %547 = vperm.xlu1 %1848, %v1766_v9  }
  0x45   : > { %701 = vrot.lane.b32.xlu0 %v2079_v4, %s1976_s8 }
  0x48   : > { %1849 = vset.pattern.permute.xlu1 %v1974_v8 }
  0x49   : > { %730 = vperm.xlu0 %1853, %v1768_v11   ;;  %563 = vperm.xlu1 %1849, %v1766_v9  }
  0x4d   : > { %1856 = vset.pattern.permute.xlu0 %v1968_v1  ;;  %1851 = vset.pattern.permute.xlu1 %v1968_v1 }
  0x4e   : > { %531 = vperm.xlu0 %1856, %v1766_v9   ;;  %596 = vperm.xlu1 %1851, %v1767_v10  }
  0x52   : > { %777 = vrot.lane.b32.xlu0 %v2073_v3, %s1977_s14  ;;  %1852 = vset.pattern.permute.xlu1 %v1969_v2 }
  0x53   : > { %622 = vperm.xlu1 %1852, %v1767_v10  }
  0x56   : > { %792 = vperm.xlu0 %1856, %v1769_v12  }
  0x57   : > { %1854 = vset.pattern.permute.xlu1 %v1971_v5 }
  0x58   : > { %674 = vperm.xlu1 %1854, %v1767_v10  }
  0x5a   : > { %1861 = vset.pattern.permute.xlu0 %v1971_v5 }
  0x5b   : > { %840 = vperm.xlu0 %1861, %v1769_v12  }
  0x5c   : > { %699 = vrot.lane.b32.xlu1 %v2073_v3, %s1976_s8 }
  0x5d   : > { %1855 = vset.pattern.permute.xlu1 %v1968_v1 }
  0x5f   : > { %855 = vrot.lane.b32.xlu0 %v2073_v3, %s1978_s23 }
  0x60   : > { %1864 = vset.pattern.permute.xlu0 %v1974_v8  ;;  %714 = vperm.xlu1 %1855, %v1768_v11  }
  0x63   : > { %902 = vperm.xlu0 %1864, %v1770_v13  }
  0x64   : > { %1857 = vset.pattern.permute.xlu1 %v1974_v8 }
  0x65   : > { %746 = vperm.xlu1 %1857, %v1768_v11  }
  0x67   : > { %1867 = vset.pattern.permute.xlu0 %v1969_v2 }
  0x68   : > { %964 = vperm.xlu0 %1867, %v1771_v14  }
  0x69   : > { %1858 = vset.pattern.permute.xlu1 %v1971_v5 }
  0x6a   : > { %762 = vperm.xlu1 %1858, %v1768_v11  }
  0x6c   : > { %1868 = vset.pattern.permute.xlu0 %v1974_v8 }
  0x6d   : > { %980 = vperm.xlu0 %1868, %v1771_v14  }
  0x6e   : > { %779 = vrot.lane.b32.xlu1 %v2079_v4, %s1977_s14 }
  0x6f   : > { %1859 = vset.pattern.permute.xlu1 %v1969_v2 }
  0x71   : > { %1873 = vset.pattern.permute.xlu0 %v1971_v5 }
  0x72   : > { %1076 = vperm.xlu0 %1873, %v2152_v15   ;;  %808 = vperm.xlu1 %1859, %v1769_v12  }
  0x76   : > { %1149 = vperm.xlu0 %1873, %v2159_v16   ;;  %1860 = vset.pattern.permute.xlu1 %v1974_v8 }
  0x77   : > { %824 = vperm.xlu1 %1860, %v1769_v12  }
  0x7a   : > { %1222 = vperm.xlu0 %1873, %v2168_v17  }
  0x7b   : > { %1862 = vset.pattern.permute.xlu1 %v1968_v1 }
  0x7c   : > { %870 = vperm.xlu1 %1862, %v1770_v13  }
  0x7e   : > { %1880 = vset.pattern.permute.xlu0 %v1974_v8 }
  0x7f   : > { %1279 = vperm.xlu0 %1880, %v2175_v18  }
  0x80   : > { %1863 = vset.pattern.permute.xlu1 %v1969_v2 }
  0x81   : > { %886 = vperm.xlu1 %1863, %v1770_v13  }
  0x83   : > { %1883 = vset.pattern.permute.xlu0 %v1969_v2 }
  0x84   : > { %1328 = vperm.xlu0 %1883, %v2183_v19  }
  0x85   : > { %857 = vrot.lane.b32.xlu1 %v2079_v4, %s1978_s23 }
  0x86   : > { %1865 = vset.pattern.permute.xlu1 %v1971_v5 }
  0x88   : > { %1884 = vset.pattern.permute.xlu0 %v1968_v1 }
  0x89   : > { %1030 = vperm.xlu0 %1884, %v2152_v15   ;;  %918 = vperm.xlu1 %1865, %v1770_v13  }
  0x8c   : > { %v285_v20 = vpop.permute.xlu0 %284 }
  0x8d   : > { %1866 = vset.pattern.permute.xlu1 %v1968_v1 }
  0x8e   : > { %v300_v21 = vpop.permute.xlu1 %299  ;;  %948 = vperm.xlu1 %1866, %v1771_v14  }
  0x90   : > { %v287_v22 = vpop.permute.xlu0 %286 }
  0x91   : > { %v289_v40 = vsel %vm288_vm2, %v285_v20, %v287_v22  ;;  %v290_v41 = vsel %vm288_vm2, %v287_v22, %v285_v20 }
  0x92   : > { %933 = vrot.lane.b32.xlu1 %v2073_v3, %s1979_s15  ;;  %v295_v45 = vsel %vm2236_vm4, %v290_v41, 0.0  ;;  %v296_v46 = vsel %vm2228_vm3, %v289_v40, 0.0 }
  0x93   : > { %v314_v23 = vpop.permute.xlu1 %313  ;;  %1869 = vset.pattern.permute.xlu1 %v1971_v5  ;;  %v319_v48 = vrot.slane %v295_v45, %v2245_v42  ;;  %v323_v49 = vrot.slane %v296_v46, %v2245_v42  ;;  %v305_v51 = vrot.slane %v295_v45, %v2250_v44  ;;  %v309_v52 = vrot.slane %v296_v46, %v2250_v44 }
  0x94   : > { %v363_v25 = vpop.permute.xlu0 %362  ;;  %v335_v59 = vrot.slane %v295_v45, %v2268_v53  ;;  %v339_v60 = vrot.slane %v296_v46, %v2268_v53  ;;  %v351_v7 = vrot.slane %v295_v45, %v2273_v57  ;;  %v355_v9 = vrot.slane %v296_v46, %v2273_v57 }
  0x95   : > { %v324_v55 = vmul.f32 %v319_v48, %v314_v23  ;;  %v325_v56 = vmul.f32 %v323_v49, %v314_v23  ;;  %v310_v61 = vmul.f32 %v305_v51, %v300_v21  ;;  %v311_v62 = vmul.f32 %v309_v52, %v300_v21 }
  0x96   : > { %935 = vrot.lane.b32.xlu1 %v2079_v4, %s1979_s15 }
  0x97   : > { %v326_v0 = vadd.f32 %v324_v55, %v310_v61  ;;  %v327_v6 = vadd.f32 %v325_v56, %v311_v62 }
  0x98   : > { %v2199_v26 = vpop.permute.xlu1 %345  ;;  %v2209_v31 = vpop.permute.xlu0 %438 }
  0x99   : > { %v356_v23 = vmul.f32 %v351_v7, %v2199_v26  ;;  %v357_v24 = vmul.f32 %v355_v9, %v2199_v26 }
  0x9a   : > { %996 = vperm.xlu1 %1869, %v1771_v14  }
  0x9c   : > { %v361_v28 = vpop.permute.xlu1 %360 }
  0x9d   : > { %v366_v63 = vsel %vm364_vm5, %v363_v25, %v361_v28  ;;  %v365_v11 = vsel %vm364_vm5, %v361_v28, %v363_v25 }
  0x9e   : > { %1870 = vset.pattern.permute.xlu1 %v1968_v1  ;;  %v371_v12 = vsel %vm228_vm0, %v366_v63, 0.0  ;;  %v385_v28 = vrot.slane %v365_v11, %v2250_v44  ;;  %v401_v52 = vrot.slane %v365_v11, %v2245_v42  ;;  %v417_v56 = vrot.slane %v365_v11, %v2268_v53 }
  0x9f   : > { %1013 = vperm.xlu1 %1870, %v278_v29   ;;  %v381_v25 = vrot.slane %v371_v12, %v2250_v44  ;;  %v397_v51 = vrot.slane %v371_v12, %v2245_v42  ;;  %v413_v55 = vrot.slane %v371_v12, %v2268_v53  ;;  %v429_v7 = vrot.slane %v371_v12, %v2273_v57 }
  0xa0   : > { %v2213_v33 = vpop.permute.xlu1 %375  ;;  %v433_v9 = vrot.slane %v365_v11, %v2273_v57 }
  0xa1   : > { %v386_v48 = vmul.f32 %v381_v25, %v2213_v33  ;;  %v387_v49 = vmul.f32 %v385_v28, %v2213_v33 }
  0xa3   : > { %1871 = vset.pattern.permute.xlu1 %v1969_v2 }
  0xa4   : > { %1044 = vperm.xlu1 %1871, %v2152_v15  }
  0xa5   : > { %v2247_v43 = vpop.permute.xlu1 %407 }
  0xa8   : > { %1872 = vset.pattern.permute.xlu1 %v1974_v8 }
  0xa9   : > { %v2225_v37 = vpop.permute.xlu0 %453  ;;  %1060 = vperm.xlu1 %1872, %v2152_v15  }
  0xaa   : > { %v2262_v50 = vpop.permute.xlu1 %423 }
  0xad   : > { %1874 = vset.pattern.permute.xlu1 %v1969_v2 }
  0xae   : > { %v2257_v47 = vpop.permute.xlu0 %501  ;;  %1117 = vperm.xlu1 %1874, %v2159_v16   ;;  %v441_v58 = vpop.permute.xlu1 %440 }
  0xaf   : > { %v443_v26 = vsel %vm442_vm7, %v2209_v31, %v441_v58  ;;  %v444_v41 = vsel %vm442_vm7, %v441_v58, %v2209_v31 }
  0xb0   : > { %v449_v31 = vsel %vm2310_vm9, %v444_v41, 0.0  ;;  %v450_v58 = vsel %vm2302_vm8, %v443_v26, 0.0 }
  0xb1   : > { %v475_v12 = vrot.slane %v449_v31, %v2245_v42  ;;  %v479_v11 = vrot.slane %v450_v58, %v2245_v42 }
  0xb2   : > { %v2270_v54 = vpop.permute.xlu0 %579  ;;  %1875 = vset.pattern.permute.xlu1 %v1974_v8  ;;  %v2288_v15 = vpop.permute.xlu1 %469 }
  0xb3   : > { %1133 = vperm.xlu1 %1875, %v2159_v16  }
  0xb7   : > { %v330_v10 = vpop.permute.xlu0 %329  ;;  %1876 = vset.pattern.permute.xlu1 %v1969_v2  ;;  %v486_v46 = vpop.permute.xlu1 %485 }
  0xb8   : > { %v340_v13 = vmul.f32 %v335_v59, %v330_v10  ;;  %v341_v14 = vmul.f32 %v339_v60, %v330_v10  ;;  %1190 = vperm.xlu1 %1876, %v2168_v17   ;;  %v459_v10 = vrot.slane %v449_v31, %v2250_v44 }
  0xba   : > { %v342_v21 = vadd.f32 %v340_v13, %v326_v0  ;;  %v343_v22 = vadd.f32 %v341_v14, %v327_v6  ;;  %v418_v0 = vmul.f32 %v413_v55, %v2247_v43  ;;  %v419_v6 = vmul.f32 %v417_v56, %v2247_v43 }
  0xbb   : > { %v2300_v29 = vpop.permute.xlu0 %648  ;;  %v517_v33 = vpop.permute.xlu1 %516  ;;  %v463_v13 = vrot.slane %v450_v58, %v2250_v44  ;;  %v464_v26 = vmul.f32 %v459_v10, %v2225_v37  ;;  %v491_v55 = vrot.slane %v449_v31, %v2268_v53  ;;  %v495_v56 = vrot.slane %v450_v58, %v2268_v53 }
  0xbc   : > { %v358_v34 = vadd.f32 %v356_v23, %v342_v21  ;;  %v359_v45 = vadd.f32 %v357_v24, %v343_v22  ;;  %1877 = vset.pattern.permute.xlu1 %v1974_v8  ;;  %v434_v22 = vmul.f32 %v429_v7, %v2262_v50  ;;  %v435_v23 = vmul.f32 %v433_v9, %v2262_v50 }
  0xbd   : > { %1206 = vperm.xlu1 %1877, %v2168_v17   ;;  %v465_v41 = vmul.f32 %v463_v13, %v2225_v37  ;;  %v497_v7 = vmul.f32 %v495_v56, %v486_v46  ;;  %v602_v56 = vrot.slane %v2073_v3, %v2250_v44 }
  0xbe   : > { %v388_v60 = vadd.f32 %v386_v48, %v358_v34  ;;  %v389_v61 = vadd.f32 %v387_v49, %v359_v45 }
  0xbf   : > { %v519_v25 = vpop.permute.xlu1 %518 }
  0xc0   : > { %v392_v59 = vpop.permute.xlu0 %391 }
  0xc1   : > { %v402_v62 = vmul.f32 %v397_v51, %v392_v59  ;;  %v403_v63 = vmul.f32 %v401_v52, %v392_v59  ;;  %1878 = vset.pattern.permute.xlu1 %v1968_v1  ;;  %v480_v51 = vmul.f32 %v475_v12, %v2288_v15  ;;  %v481_v52 = vmul.f32 %v479_v11, %v2288_v15 }
  0xc2   : > { %1247 = vperm.xlu1 %1878, %v2175_v18   ;;  %v521_v59 = vsel %vm520_vm10, %v517_v33, %v519_v25  ;;  %v507_v15 = vrot.slane %v449_v31, %v2273_v57 }
  0xc3   : > { %v404_v14 = vadd.f32 %v402_v62, %v388_v60  ;;  %v405_v21 = vadd.f32 %v403_v63, %v389_v61  ;;  %v548_v49 = vpop.permute.xlu1 %547  ;;  %v522_v60 = vsel %vm520_vm10, %v519_v25, %v517_v33  ;;  %v528_v10 = vsel %vm2228_vm3, %v521_v59, 0.0 }
  0xc4   : > { %v2344_v28 = vpop.permute.xlu0 %701  ;;  %v527_v9 = vsel %vm2217_vm1, %v522_v60, 0.0  ;;  %v557_v11 = vrot.slane %v528_v10, %v2245_v42  ;;  %v631_v60 = vsub.s32 5, %v2222_v36 }
  0xc5   : > { %v420_v24 = vadd.f32 %v418_v0, %v404_v14  ;;  %v421_v43 = vadd.f32 %v419_v6, %v405_v21  ;;  %v511_v0 = vrot.slane %v450_v58, %v2273_v57  ;;  %v496_v6 = vmul.f32 %v491_v55, %v486_v46 }
  0xc6   : > { %1879 = vset.pattern.permute.xlu1 %v1969_v2  ;;  %v512_v21 = vmul.f32 %v507_v15, %v2257_v47  ;;  %v537_v58 = vrot.slane %v527_v9, %v2250_v44  ;;  %v541_v46 = vrot.slane %v528_v10, %v2250_v44  ;;  %v553_v12 = vrot.slane %v527_v9, %v2245_v42 }
  0xc7   : > { %v436_v34 = vadd.f32 %v434_v22, %v420_v24  ;;  %v437_v45 = vadd.f32 %v435_v23, %v421_v43  ;;  %1263 = vperm.xlu1 %1879, %v2175_v18   ;;  %v513_v31 = vmul.f32 %v511_v0, %v2257_v47  ;;  %v657_v0 = vsub.s32 6, %v2222_v36 }
  0xc8   : > { %v2355_v37 = vpop.permute.xlu0 %730  ;;  %v564_v63 = vpop.permute.xlu1 %563 }
  0xc9   : > { %v466_v50 = vadd.f32 %v464_v26, %v436_v34  ;;  %v467_v48 = vadd.f32 %v465_v41, %v437_v45  ;;  %v605_v41 = vsub.s32 4, %v2222_v36  ;;  %v558_v34 = vmul.f32 %v553_v12, %v548_v49 }
  0xca   : > { %v559_v45 = vmul.f32 %v557_v11, %v548_v49  ;;  %v585_v49 = vrot.slane %v527_v9, %v2273_v57 }
  0xcb   : > { %v482_v61 = vadd.f32 %v480_v51, %v466_v50  ;;  %v483_v62 = vadd.f32 %v481_v52, %v467_v48  ;;  %1881 = vset.pattern.permute.xlu1 %v1971_v5  ;;  %v569_v51 = vrot.slane %v527_v9, %v2268_v53  ;;  %v573_v52 = vrot.slane %v528_v10, %v2268_v53 }
  0xcc   : > { %1295 = vperm.xlu1 %1881, %v2175_v18   ;;  %v606_v59 = vrot.slane %v2073_v3, %v605_v41  ;;  %v612_v9 = vrot.slane %v602_v56, %v2250_v44 }
  0xcd   : > { %v498_v13 = vadd.f32 %v496_v6, %v482_v61  ;;  %v499_v14 = vadd.f32 %v497_v7, %v483_v62  ;;  %v532_v33 = vpop.permute.xlu0 %531  ;;  %v597_v22 = vpop.permute.xlu1 %596  ;;  %v589_v61 = vrot.slane %v528_v10, %v2273_v57  ;;  %v574_v62 = vmul.f32 %v569_v51, %v564_v63 }
  0xce   : > { %v542_v43 = vmul.f32 %v537_v58, %v532_v33  ;;  %v543_v25 = vmul.f32 %v541_v46, %v532_v33  ;;  %v575_v15 = vmul.f32 %v573_v52, %v564_v63  ;;  %v632_v33 = vrot.slane %v2073_v3, %v631_v60 }
  0xcf   : > { %v514_v23 = vadd.f32 %v512_v21, %v498_v13  ;;  %v515_v24 = vadd.f32 %v513_v31, %v499_v14  ;;  %v628_v14 = vrot.slane %v2073_v3, %v2245_v42  ;;  %v616_v10 = vrot.slane %v606_v59, %v2250_v44 }
  0xd0   : > { %1882 = vset.pattern.permute.xlu1 %v1968_v1  ;;  %v590_v63 = vmul.f32 %v585_v49, %v2270_v54  ;;  %v591_v21 = vmul.f32 %v589_v61, %v2270_v54  ;;  %v654_v31 = vrot.slane %v2073_v3, %v2268_v53  ;;  %v658_v58 = vrot.slane %v2073_v3, %v657_v0 }
  0xd1   : > { %1312 = vperm.xlu1 %1882, %v2183_v19   ;;  %v544_v26 = vadd.f32 %v542_v43, %v514_v23  ;;  %v545_v47 = vadd.f32 %v543_v25, %v515_v24  ;;  %v683_v23 = vsub.s32 7, %v2222_v36  ;;  %v638_v43 = vrot.slane %v628_v14, %v2245_v42 }
  0xd2   : > { %v623_v18 = vpop.permute.xlu1 %622  ;;  %v642_v25 = vrot.slane %v632_v33, %v2245_v42  ;;  %v617_v12 = vmul.f32 %v612_v9, %v597_v22  ;;  %v618_v11 = vmul.f32 %v616_v10, %v597_v22  ;;  %v664_v54 = vrot.slane %v654_v31, %v2268_v53  ;;  %v778_v31 = vpop.permute.xlu0 %777 }
  0xd3   : > { %v560_v50 = vadd.f32 %v558_v34, %v544_v26  ;;  %v561_v48 = vadd.f32 %v559_v45, %v545_v47  ;;  %v668_v26 = vrot.slane %v658_v58, %v2268_v53  ;;  %v680_v36 = vrot.slane %v2073_v3, %v2273_v57 }
  0xd4   : > { %v684_v34 = vrot.slane %v2073_v3, %v683_v23  ;;  %v643_v45 = vmul.f32 %v638_v43, %v623_v18 }
  0xd5   : > { %1885 = vset.pattern.permute.xlu1 %v1974_v8  ;;  %v576_v6 = vadd.f32 %v574_v62, %v560_v50  ;;  %v577_v7 = vadd.f32 %v575_v15, %v561_v48  ;;  %v644_v50 = vmul.f32 %v642_v25, %v623_v18  ;;  %v690_v52 = vrot.slane %v680_v36, %v2273_v57 }
  0xd6   : > { %1344 = vperm.xlu1 %1885, %v2183_v19   ;;  %v694_v56 = vrot.slane %v684_v34, %v2273_v57  ;;  %v669_v18 = vmul.f32 %v664_v54, %v2300_v29  ;;  %v670_v60 = vmul.f32 %v668_v26, %v2300_v29 }
  0xd7   : > { %v675_v55 = vpop.permute.xlu1 %674  ;;  %v593_v46 = vadd.f32 %v591_v21, %v577_v7 }
  0xd8   : > { %v695_v7 = vmul.f32 %v690_v52, %v675_v55 }
  0xd9   : > { %v620_v41 = vadd.f32 %v618_v11, %v593_v46 }
  0xda   : > { %1886 = vset.pattern.permute.xlu1 %v1971_v5 }
  0xdb   : > { %1360 = vperm.xlu1 %1886, %v2183_v19   ;;  %v700_v13 = vpop.permute.xlu1 %699  ;;  %v592_v19 = vadd.f32 %v590_v63, %v576_v6  ;;  %v646_v61 = vadd.f32 %v644_v50, %v620_v41 }
  0xdc   : > { %v704_v48 = vsel %vm703_vm11, %v700_v13, %v2344_v28  ;;  %v705_v22 = vsel %vm703_vm11, %v2344_v28, %v700_v13  ;;  %v696_v13 = vmul.f32 %v694_v56, %v675_v55 }
  0xdd   : > { %v619_v47 = vadd.f32 %v617_v12, %v592_v19  ;;  %v710_v59 = vsel %vm2291_vm6, %v704_v48, 0.0  ;;  %v711_v3 = vsel %vm2302_vm8, %v705_v22, 0.0  ;;  %v672_v6 = vadd.f32 %v670_v60, %v646_v61 }
  0xde   : > { %v720_v28 = vrot.slane %v710_v59, %v2250_v44  ;;  %v724_v15 = vrot.slane %v711_v3, %v2250_v44  ;;  %v736_v63 = vrot.slane %v710_v59, %v2245_v42  ;;  %v740_v21 = vrot.slane %v711_v3, %v2245_v42 }
  0xdf   : > { %v715_v24 = vpop.permute.xlu1 %714  ;;  %1887 = vset.pattern.permute.xlu1 %v1969_v2  ;;  %v645_v49 = vadd.f32 %v643_v45, %v619_v47  ;;  %v698_v29 = vadd.f32 %v696_v13, %v672_v6  ;;  %v752_v54 = vrot.slane %v710_v59, %v2268_v53  ;;  %v756_v26 = vrot.slane %v711_v3, %v2268_v53 }
  0xe0   : > { %v725_v33 = vmul.f32 %v720_v28, %v715_v24  ;;  %v726_v9 = vmul.f32 %v724_v15, %v715_v24  ;;  %v741_v43 = vmul.f32 %v736_v63, %v2355_v37  ;;  %v742_v25 = vmul.f32 %v740_v21, %v2355_v37 }
  0xe1   : > { %v671_v0 = vadd.f32 %v669_v18, %v645_v49  ;;  %v768_v36 = vrot.slane %v710_v59, %v2273_v57  ;;  %v772_v34 = vrot.slane %v711_v3, %v2273_v57  ;;  %v793_v18 = vpop.permute.xlu0 %792 }
  0xe2   : > { %v728_v24 = vadd.f32 %v726_v9, %v698_v29 }
  0xe3   : > { %v697_v10 = vadd.f32 %v695_v7, %v671_v0 }
  0xe4   : > { %v747_v51 = vpop.permute.xlu1 %746  ;;  %v744_v41 = vadd.f32 %v742_v25, %v728_v24 }
  0xe5   : > { %v727_v23 = vadd.f32 %v725_v33, %v697_v10  ;;  %v757_v50 = vmul.f32 %v752_v54, %v747_v51  ;;  %v758_v48 = vmul.f32 %v756_v26, %v747_v51  ;;  %v841_v13 = vpop.permute.xlu0 %840 }
  0xe7   : > { %v743_v47 = vadd.f32 %v741_v43, %v727_v23  ;;  %v760_v49 = vadd.f32 %v758_v48, %v744_v41 }
  0xe9   : > { %v763_v62 = vpop.permute.xlu1 %762  ;;  %v759_v60 = vadd.f32 %v757_v50, %v743_v47 }
  0xea   : > { %v773_v52 = vmul.f32 %v768_v36, %v763_v62  ;;  %v774_v56 = vmul.f32 %v772_v34, %v763_v62 }
  0xec   : > { %v775_v0 = vadd.f32 %v773_v52, %v759_v60  ;;  %v776_v6 = vadd.f32 %v774_v56, %v760_v49 }
  0xed   : > { %v780_v14 = vpop.permute.xlu1 %779 }
  0xee   : > { %v782_v58 = vsel %vm2826_vm13, %v778_v31, %v780_v14  ;;  %v783_v19 = vsel %vm2826_vm13, %v780_v14, %v778_v31  ;;  %vm2483_vm13 = vmand %vm231_vm12, %vm2302_vm8 }
  0xef   : > { %v788_v12 = vsel %vm2217_vm1, %v782_v58, 0.0  ;;  %v789_v11 = vsel %vm2437_vm14, %v783_v19, 0.0  ;;  %v856_v58 = vpop.permute.xlu0 %855 }
  0xf0   : > { %v798_v37 = vrot.slane %v788_v12, %v2250_v44  ;;  %v802_v22 = vrot.slane %v789_v11, %v2250_v44  ;;  %v814_v59 = vrot.slane %v788_v12, %v2245_v42  ;;  %v818_v3 = vrot.slane %v789_v11, %v2245_v42 }
  0xf1   : > { %v809_v46 = vpop.permute.xlu1 %808  ;;  %v830_v62 = vrot.slane %v788_v12, %v2268_v53  ;;  %v834_v10 = vrot.slane %v789_v11, %v2268_v53  ;;  %v846_v23 = vrot.slane %v788_v12, %v2273_v57  ;;  %v850_v24 = vrot.slane %v789_v11, %v2273_v57 }
  0xf2   : > { %v803_v61 = vmul.f32 %v798_v37, %v793_v18  ;;  %v804_v28 = vmul.f32 %v802_v22, %v793_v18  ;;  %v819_v33 = vmul.f32 %v814_v59, %v809_v46  ;;  %v820_v9 = vmul.f32 %v818_v3, %v809_v46 }
  0xf3   : > { %v851_v34 = vmul.f32 %v846_v23, %v841_v13  ;;  %v852_v12 = vmul.f32 %v850_v24, %v841_v13 }
  0xf4   : > { %v805_v7 = vadd.f32 %v803_v61, %v775_v0  ;;  %v806_v51 = vadd.f32 %v804_v28, %v776_v6  ;;  %v903_v0 = vpop.permute.xlu0 %902 }
  0xf6   : > { %v825_v45 = vpop.permute.xlu1 %824  ;;  %v821_v29 = vadd.f32 %v819_v33, %v805_v7  ;;  %v822_v63 = vadd.f32 %v820_v9, %v806_v51 }
  0xf7   : > { %v835_v21 = vmul.f32 %v830_v62, %v825_v45  ;;  %v836_v31 = vmul.f32 %v834_v10, %v825_v45 }
  0xf9   : > { %v837_v26 = vadd.f32 %v835_v21, %v821_v29  ;;  %v838_v47 = vadd.f32 %v836_v31, %v822_v63  ;;  %v965_v31 = vpop.permute.xlu0 %964 }
  0xfb   : > { %v871_v15 = vpop.permute.xlu1 %870  ;;  %v853_v50 = vadd.f32 %v851_v34, %v837_v26  ;;  %v854_v48 = vadd.f32 %v852_v12, %v838_v47 }
 0x100   : > { %v887_v14 = vpop.permute.xlu1 %886 }
 0x104   : > { %v858_v19 = vpop.permute.xlu1 %857 }
 0x105   : > { %v860_v43 = vsel %vm2825_vm15, %v856_v58, %v858_v19  ;;  %v861_v46 = vsel %vm2825_vm15, %v858_v19, %v856_v58  ;;  %vm937_vm15 = vcmp.lt.s32.totalorder %v2201_v27, 111 }
 0x106   : > { %v867_v25 = vsel %vm231_vm12, %v861_v46, 0.0  ;;  %v876_v54 = vrot.slane %v860_v43, %v2250_v44  ;;  %v892_v37 = vrot.slane %v860_v43, %v2245_v42  ;;  %v908_v61 = vrot.slane %v860_v43, %v2268_v53 }
 0x107   : > { %v880_v41 = vrot.slane %v867_v25, %v2250_v44  ;;  %v896_v22 = vrot.slane %v867_v25, %v2245_v42  ;;  %v912_v28 = vrot.slane %v867_v25, %v2268_v53  ;;  %v924_v51 = vrot.slane %v860_v43, %v2273_v57 }
 0x108   : > { %v919_v36 = vpop.permute.xlu1 %918  ;;  %v881_v45 = vmul.f32 %v876_v54, %v871_v15  ;;  %v897_v60 = vmul.f32 %v892_v37, %v887_v14  ;;  %v928_v13 = vrot.slane %v867_v25, %v2273_v57  ;;  %v981_v37 = vpop.permute.xlu0 %980 }
 0x109   : > { %v882_v11 = vmul.f32 %v880_v41, %v871_v15  ;;  %v898_v49 = vmul.f32 %v896_v22, %v887_v14  ;;  %v913_v15 = vmul.f32 %v908_v61, %v903_v0  ;;  %v914_v7 = vmul.f32 %v912_v28, %v903_v0 }
 0x10a   : > { %v883_v52 = vadd.f32 %v881_v45, %v853_v50  ;;  %v929_v63 = vmul.f32 %v924_v51, %v919_v36  ;;  %v930_v21 = vmul.f32 %v928_v13, %v919_v36 }
 0x10b   : > { %v884_v56 = vadd.f32 %v882_v11, %v854_v48 }
 0x10c   : > { %v899_v6 = vadd.f32 %v897_v60, %v883_v52 }
 0x10d   : > { %v949_v18 = vpop.permute.xlu1 %948  ;;  %v900_v59 = vadd.f32 %v898_v49, %v884_v56 }
 0x10e   : > { %v915_v33 = vadd.f32 %v913_v15, %v899_v6 }
 0x10f   : > { %v916_v9 = vadd.f32 %v914_v7, %v900_v59 }
 0x110   : > { %v931_v25 = vadd.f32 %v929_v63, %v915_v33  ;;  %v1776_v33 = vld [vmem:[%s2822_s3 + $0x14] sm:$0xf] }
 0x111   : > { %v934_v3 = vpop.permute.xlu1 %933  ;;  %v932_v54 = vadd.f32 %v930_v21, %v916_v9  ;;  %v1077_v21 = vpop.permute.xlu0 %1076 }
 0x115   : > { %v936_v62 = vpop.permute.xlu1 %935 }
 0x116   : > { %v938_v10 = vsel %vm937_vm15, %v934_v3, %v936_v62  ;;  %v939_v29 = vsel %vm937_vm15, %v936_v62, %v934_v3  ;;  %v1779_v62 = vld [vmem:[%s2822_s3 + $0x20] sm:$0xf] }
 0x117   : > { %v944_v58 = vsel %vm2291_vm6, %v938_v10, 0.0  ;;  %v945_v19 = vsel %vm2483_vm13, %v939_v29, 0.0 }
 0x118   : > { %v954_v23 = vrot.slane %v944_v58, %v2250_v44  ;;  %v958_v24 = vrot.slane %v945_v19, %v2250_v44  ;;  %v970_v43 = vrot.slane %v944_v58, %v2245_v42  ;;  %v974_v46 = vrot.slane %v945_v19, %v2245_v42 }
 0x119   : > { %v986_v41 = vrot.slane %v944_v58, %v2268_v53  ;;  %v990_v36 = vrot.slane %v945_v19, %v2268_v53  ;;  %v1002_v34 = vrot.slane %v944_v58, %v2273_v57  ;;  %v1006_v12 = vrot.slane %v945_v19, %v2273_v57  ;;  %v997_v22 = vpop.permute.xlu1 %996  ;;  %v2576_v58 = vpop.permute.xlu0 %1149 }
 0x11a   : > { %v959_v26 = vmul.f32 %v954_v23, %v949_v18  ;;  %v960_v47 = vmul.f32 %v958_v24, %v949_v18  ;;  %v975_v50 = vmul.f32 %v970_v43, %v965_v31  ;;  %v976_v48 = vmul.f32 %v974_v46, %v965_v31  ;;  %v279_v23 = vld [vmem:[%s2823_s4] sm:$0xf] }
 0x11b   : > { %v991_v60 = vmul.f32 %v986_v41, %v981_v37  ;;  %v992_v49 = vmul.f32 %v990_v36, %v981_v37  ;;  %v1007_v28 = vmul.f32 %v1002_v34, %v997_v22  ;;  %v1008_v0 = vmul.f32 %v1006_v12, %v997_v22 }
 0x11c   : > { %v961_v45 = vadd.f32 %v959_v26, %v931_v25  ;;  %v962_v11 = vadd.f32 %v960_v47, %v932_v54 }
 0x11d   : > { %v2584_v24 = vpop.permute.xlu0 %1222 }
 0x11e   : > { %v977_v52 = vadd.f32 %v975_v50, %v961_v45  ;;  %v978_v56 = vadd.f32 %v976_v48, %v962_v11  ;;  %v1014_v6 = vpop.permute.xlu1 %1013 }
 0x120   : > { %v993_v61 = vadd.f32 %v991_v60, %v977_v52  ;;  %v994_v18 = vadd.f32 %v992_v49, %v978_v56 }
 0x121   : > { %v2588_v43 = vpop.permute.xlu0 %1279 }
 0x122   : > { %v1009_v59 = vadd.f32 %v1007_v28, %v993_v61  ;;  %v1010_v3 = vadd.f32 %v1008_v0, %v994_v18 }
 0x123   : > { %v1045_v9 = vpop.permute.xlu1 %1044 }
 0x124   : > { %v1016_v15 = vadd.f32 %v1014_v6, %v1009_v59  ;;  %v1017_v7 = vadd.f32 %v1014_v6, %v1010_v3 }
 0x125   : > { %v2592_v25 = vpop.permute.xlu0 %1328 }
 0x126   : > { %v2503_v51 = vmax.f32 %v1016_v15, 0.0  ;;  %v2505_v13 = vmax.f32 %v1017_v7, 0.0 }
 0x128   : > { %1022 = vrot.lane.b32.xlu1 %v2505_v13, %s1970_s12  ;;  %1020 = vrot.lane.b32.xlu0 %v2503_v51, %s1970_s12  ;;  %v1061_v10 = vpop.permute.xlu1 %1060 }
 0x129   : > { %v1031_v26 = vpop.permute.xlu0 %1030 }
 0x12c   : > { %1091 = vrot.lane.b32.xlu1 %v2503_v51, %s1972_s13  ;;  %1101 = vperm.xlu0 %1884, %v2159_v16   ;;  %v1777_v16 = vld [vmem:[%s2822_s3 + $0x18] sm:$0xf] }
 0x130   : > { %1093 = vrot.lane.b32.xlu1 %v2505_v13, %s1972_s13  ;;  %1174 = vperm.xlu0 %1884, %v2168_v17   ;;  %v1778_v17 = vld [vmem:[%s2822_s3 + $0x1c] sm:$0xf]  ;;  %s1904_s13 = scalar_lea.vmem %s2779_s25, 128 }
 0x131   : > { %p1905_p11 = scmp.ne.s32.totalorder %s2779_s25, %s1904_s13 }
 0x133   : > { %p1906_p12 = pnand %p1905_p11, %p2049_p5 }
 0x134   : > { %1164 = vrot.lane.b32.xlu1 %v2503_v51, %s1973_s16  ;;  %1237 = vrot.lane.b32.xlu0 %v2503_v51, %s1975_s7 }
 0x135   : > { %p1907_p13 = pneg %p1906_p12 }
 0x138   : > { %1166 = vrot.lane.b32.xlu1 %v2505_v13, %s1973_s16  ;;  %1385 = vperm.xlu0 %1884, %v1776_v33  }
 0x13c   : > { %1401 = vperm.xlu1 %1887, %v1776_v33   ;;  %1377 = vrot.lane.b32.xlu0 %v2505_v13, %s1976_s8 }
 0x13d   : > { %1889 = vset.pattern.permute.xlu0 %v1971_v5 }
 0x140   : > { %1239 = vrot.lane.b32.xlu1 %v2505_v13, %s1975_s7  ;;  %1433 = vperm.xlu0 %1889, %v1776_v33  }
 0x141   : > { %1888 = vset.pattern.permute.xlu1 %v1974_v8 }
 0x144   : > { %1375 = vrot.lane.b32.xlu1 %v2503_v51, %s1976_s8  ;;  %1448 = vrot.lane.b32.xlu0 %v2503_v51, %s1977_s14 }
 0x145   : > { %1892 = vset.pattern.permute.xlu0 %v1974_v8 }
 0x148   : > { %1417 = vperm.xlu1 %1888, %v1776_v33   ;;  %1490 = vperm.xlu0 %1892, %v1777_v16  }
 0x14c   : > { %1890 = vset.pattern.permute.xlu1 %v1968_v1  ;;  %1563 = vperm.xlu0 %1892, %v1778_v17  }
 0x14d   : > { %1458 = vperm.xlu1 %1890, %v1777_v16  }
 0x150   : > { %1895 = vset.pattern.permute.xlu0 %v1969_v2 }
 0x151   : > { %1891 = vset.pattern.permute.xlu1 %v1969_v2  ;;  %1547 = vperm.xlu0 %1895, %v1778_v17   ;;  %v2555_v2 = vpop.permute.xlu1 %1117 }
 0x152   : > { %1474 = vperm.xlu1 %1891, %v1777_v16  }
 0x155   : > { %1620 = vperm.xlu0 %1895, %v1779_v62   ;;  %v2560_v29 = vpop.permute.xlu1 %1133 }
 0x156   : > { %1450 = vrot.lane.b32.xlu1 %v2505_v13, %s1977_s14 }
 0x157   : > { %1893 = vset.pattern.permute.xlu1 %v1971_v5 }
 0x159   : > { %1898 = vset.pattern.permute.xlu0 %v1974_v8  ;;  %v2564_v8 = vpop.permute.xlu1 %1190 }
 0x15a   : > { %1506 = vperm.xlu1 %1893, %v1777_v16   ;;  %1636 = vperm.xlu0 %1898, %v1779_v62  }
 0x15d   : > { %v2567_v63 = vpop.permute.xlu1 %1206 }
 0x15e   : > { %1894 = vset.pattern.permute.xlu1 %v1968_v1  ;;  %1901 = vset.pattern.permute.xlu0 %v1968_v1 }
 0x15f   : > { %1531 = vperm.xlu1 %1894, %v1778_v17  }
 0x161   : > { %v2572_v31 = vpop.permute.xlu1 %1247 }
 0x163   : > { %1521 = vrot.lane.b32.xlu1 %v2503_v51, %s1978_s23 }
 0x164   : > { %1896 = vset.pattern.permute.xlu1 %v1971_v5 }
 0x165   : > { %v2578_v19 = vpop.permute.xlu1 %1263 }
 0x167   : > { %1523 = vrot.lane.b32.xlu1 %v2505_v13, %s1978_s23 }
 0x16b   : > { %1579 = vperm.xlu1 %1896, %v1778_v17  }
 0x16f   : > { %1897 = vset.pattern.permute.xlu1 %v1968_v1 }
 0x170   : > { %1604 = vperm.xlu1 %1897, %v1779_v62  }
 0x174   : > { %1594 = vrot.lane.b32.xlu1 %v2503_v51, %s1979_s15 }
 0x175   : > { %1899 = vset.pattern.permute.xlu1 %v1971_v5  ;;  %v2586_v5 = vpop.permute.xlu1 %1295 }
 0x178   : > { %1596 = vrot.lane.b32.xlu1 %v2505_v13, %s1979_s15  ;;  %s1786_s15 = sshll.u32 %s2032_s22, 7  ;;  %s1980_s22 = smov [#allocation2]  }
 0x179   : > { %v2590_v46 = vpop.permute.xlu1 %1312  ;;  %s2777_s12 = scalar_lea.hbm %s2824_s5, %s1786_s15  ;;  %s1908_s16 = sshll.u32 %s1980_s22, 4  ;;  %s1909_s16 = int_to_ptr.vmem [resolvable:$false] %s1908_s16 }
 0x17a   : > { %s1910_s6 = scalar_lea.vmem %s1909_s16, 256  ;;  %p1911_p0 = scmp.lt.s32.totalorder %s2779_s25, %s1909_s16 }
 0x17b   : > { %p1912_p1 = scmp.lt.s32.totalorder %s1910_s6, %s1904_s13 }
 0x17c   : > { %1652 = vperm.xlu1 %1899, %v1779_v62  }
 0x17d   : > { %v2594_v54 = vpop.permute.xlu1 %1344  ;;  %p1913_p2 = por %p1912_p1, %p1911_p0 }
 0x17f   : > { %p1914_p3 = pnand %p1913_p2, %p1907_p13 }
 0x180   : > { %1900 = vset.pattern.permute.xlu1 %v1968_v1 }
 0x181   : > { %1669 = vperm.xlu1 %1900, %v279_v23   ;;  %v2596_v47 = vpop.permute.xlu1 %1360 }
 0x19a   : > { %v1023_v41 = vpop.permute.xlu1 %1022  ;;  %v1021_v36 = vpop.permute.xlu0 %1020 }
 0x19b   : > { %v1024_v1 = vsel %vm288_vm2, %v1021_v36, %v1023_v41  ;;  %v1025_v34 = vsel %vm288_vm2, %v1023_v41, %v1021_v36 }
 0x19c   : > { %v1026_v12 = vsel %vm2236_vm4, %v1025_v34, 0.0  ;;  %v1027_v45 = vsel %vm2228_vm3, %v1024_v1, 0.0 }
 0x19d   : > { %v1036_v11 = vrot.slane %v1026_v12, %v2250_v44  ;;  %v1040_v50 = vrot.slane %v1027_v45, %v2250_v44  ;;  %v1050_v48 = vrot.slane %v1026_v12, %v2245_v42  ;;  %v1054_v37 = vrot.slane %v1027_v45, %v2245_v42 }
 0x19e   : > { %v1066_v22 = vrot.slane %v1026_v12, %v2268_v53  ;;  %v1070_v52 = vrot.slane %v1027_v45, %v2268_v53  ;;  %v1092_v56 = vpop.permute.xlu1 %1091  ;;  %v1082_v33 = vrot.slane %v1026_v12, %v2273_v57  ;;  %v1086_v16 = vrot.slane %v1027_v45, %v2273_v57 }
 0x19f   : > { %v1041_v60 = vmul.f32 %v1036_v11, %v1031_v26  ;;  %v1042_v49 = vmul.f32 %v1040_v50, %v1031_v26  ;;  %v1055_v39 = vmul.f32 %v1050_v48, %v1045_v9  ;;  %v1056_v61 = vmul.f32 %v1054_v37, %v1045_v9 }
 0x1a0   : > { %v1071_v18 = vmul.f32 %v1066_v22, %v1061_v10  ;;  %v1072_v28 = vmul.f32 %v1070_v52, %v1061_v10  ;;  %v1087_v10 = vmul.f32 %v1082_v33, %v1077_v21  ;;  %v1088_v23 = vmul.f32 %v1086_v16, %v1077_v21 }
 0x1a1   : > { %v1057_v0 = vadd.f32 %v1055_v39, %v1041_v60  ;;  %v1058_v6 = vadd.f32 %v1056_v61, %v1042_v49 }
 0x1a2   : > { %v1094_v59 = vpop.permute.xlu1 %1093 }
 0x1a3   : > { %v1073_v3 = vadd.f32 %v1071_v18, %v1057_v0  ;;  %v1074_v15 = vadd.f32 %v1072_v28, %v1058_v6  ;;  %v1096_v7 = vsel %vm364_vm5, %v1094_v59, %v1092_v56  ;;  %v1095_v62 = vsel %vm364_vm5, %v1092_v56, %v1094_v59 }
 0x1a4   : > { %v1097_v9 = vsel %vm228_vm0, %v1096_v7, 0.0  ;;  %v1127_v41 = vrot.slane %v1095_v62, %v2245_v42  ;;  %v1111_v34 = vrot.slane %v1095_v62, %v2250_v44  ;;  %v1143_v45 = vrot.slane %v1095_v62, %v2268_v53 }
 0x1a5   : > { %v1123_v26 = vrot.slane %v1097_v9, %v2245_v42  ;;  %v1107_v1 = vrot.slane %v1097_v9, %v2250_v44  ;;  %v1139_v12 = vrot.slane %v1097_v9, %v2268_v53  ;;  %v1089_v48 = vadd.f32 %v1087_v10, %v1073_v3 }
 0x1a6   : > { %v1165_v17 = vpop.permute.xlu1 %1164  ;;  %v1090_v37 = vadd.f32 %v1088_v23, %v1074_v15  ;;  %v1155_v56 = vrot.slane %v1097_v9, %v2273_v57  ;;  %v1159_v60 = vrot.slane %v1095_v62, %v2273_v57  ;;  %v1129_v18 = vmul.f32 %v1127_v41, %v2555_v2 }
 0x1a7   : > { %v1128_v61 = vmul.f32 %v1123_v26, %v2555_v2  ;;  %v1144_v6 = vmul.f32 %v1139_v12, %v2560_v29  ;;  %v1145_v59 = vmul.f32 %v1143_v45, %v2560_v29  ;;  %vm2845_vm0 = vcmp.lt.s32.totalorder %v2201_v27, 113 }
 0x1a8   : > { %v1160_v33 = vmul.f32 %v1155_v56, %v2576_v58  ;;  %v1161_v16 = vmul.f32 %v1159_v60, %v2576_v58  ;;  %vm2846_vm2 = vmmov %vm2845_vm0 }
 0x1aa   : > { %v1167_v36 = vpop.permute.xlu1 %1166 }
 0x1ab   : > { %v1168_v11 = vsel %vm442_vm7, %v1165_v17, %v1167_v36  ;;  %v1169_v50 = vsel %vm442_vm7, %v1167_v36, %v1165_v17  ;;  %v1102_v21 = vpop.permute.xlu0 %1101 }
 0x1ac   : > { %v1112_v22 = vmul.f32 %v1107_v1, %v1102_v21  ;;  %v1113_v52 = vmul.f32 %v1111_v34, %v1102_v21  ;;  %v1170_v49 = vsel %vm2310_vm9, %v1169_v50, 0.0  ;;  %v1171_v39 = vsel %vm2302_vm8, %v1168_v11, 0.0 }
 0x1ad   : > { %v1180_v7 = vrot.slane %v1170_v49, %v2250_v44  ;;  %v1184_v32 = vrot.slane %v1171_v39, %v2250_v44  ;;  %v1196_v62 = vrot.slane %v1170_v49, %v2245_v42  ;;  %v1200_v2 = vrot.slane %v1171_v39, %v2245_v42 }
 0x1ae   : > { %v1114_v28 = vadd.f32 %v1112_v22, %v1089_v48  ;;  %v1115_v0 = vadd.f32 %v1113_v52, %v1090_v37  ;;  %v1212_v23 = vrot.slane %v1170_v49, %v2268_v53  ;;  %v1216_v29 = vrot.slane %v1171_v39, %v2268_v53 }
 0x1af   : > { %v1175_v17 = vpop.permute.xlu0 %1174  ;;  %v1201_v34 = vmul.f32 %v1196_v62, %v2564_v8  ;;  %v1202_v12 = vmul.f32 %v1200_v2, %v2564_v8  ;;  %v1228_v56 = vrot.slane %v1170_v49, %v2273_v57  ;;  %v1232_v60 = vrot.slane %v1171_v39, %v2273_v57 }
 0x1b0   : > { %v1130_v3 = vadd.f32 %v1128_v61, %v1114_v28  ;;  %v1131_v15 = vadd.f32 %v1129_v18, %v1115_v0  ;;  %v1185_v36 = vmul.f32 %v1180_v7, %v1175_v17  ;;  %v1186_v1 = vmul.f32 %v1184_v32, %v1175_v17 }
 0x1b1   : > { %v1217_v11 = vmul.f32 %v1212_v23, %v2567_v63  ;;  %v1218_v50 = vmul.f32 %v1216_v29, %v2567_v63  ;;  %v1233_v63 = vmul.f32 %v1228_v56, %v2584_v24  ;;  %v1234_v0 = vmul.f32 %v1232_v60, %v2584_v24 }
 0x1b2   : > { %v1146_v9 = vadd.f32 %v1144_v6, %v1130_v3  ;;  %v1147_v10 = vadd.f32 %v1145_v59, %v1131_v15 }
 0x1b3   : > { %v1238_v61 = vpop.permute.xlu0 %1237 }
 0x1b4   : > { %v1162_v26 = vadd.f32 %v1160_v33, %v1146_v9  ;;  %v1163_v41 = vadd.f32 %v1161_v16, %v1147_v10 }
 0x1b6   : > { %v1187_v58 = vadd.f32 %v1185_v36, %v1162_v26  ;;  %v1188_v45 = vadd.f32 %v1186_v1, %v1163_v41  ;;  %v1334_v41 = vrot.slane %v2503_v51, %v2245_v42 }
 0x1b7   : > { %v1386_v33 = vpop.permute.xlu0 %1385 }
 0x1b8   : > { %v1203_v21 = vadd.f32 %v1201_v34, %v1187_v58  ;;  %v1204_v48 = vadd.f32 %v1202_v12, %v1188_v45  ;;  %v1318_v45 = vrot.slane %v2503_v51, %v2250_v44 }
 0x1ba   : > { %v1219_v37 = vadd.f32 %v1217_v11, %v1203_v21  ;;  %v1220_v22 = vadd.f32 %v1218_v50, %v1204_v48  ;;  %v1322_v11 = vrot.slane %v2505_v13, %v2250_v44 }
 0x1bb   : > { %v2652_v52 = vpop.permute.xlu1 %1401 }
 0x1bc   : > { %v1235_v7 = vadd.f32 %v1233_v63, %v1219_v37  ;;  %v1236_v32 = vadd.f32 %v1234_v0, %v1220_v22  ;;  %v1324_v60 = vmul.f32 %v1322_v11, %v2590_v46 }
 0x1bf   : > { %v1240_v18 = vpop.permute.xlu1 %1239 }
 0x1c0   : > { %v1241_v8 = vsel %vm520_vm10, %v1238_v61, %v1240_v18  ;;  %v1242_v28 = vsel %vm520_vm10, %v1240_v18, %v1238_v61 }
 0x1c1   : > { %v1243_v6 = vsel %vm2217_vm1, %v1242_v28, 0.0  ;;  %v1244_v49 = vsel %vm2228_vm3, %v1241_v8, 0.0  ;;  %v1350_v28 = vrot.slane %v2503_v51, %v2268_v53 }
 0x1c2   : > { %v1253_v39 = vrot.slane %v1243_v6, %v2250_v44  ;;  %v1257_v59 = vrot.slane %v1244_v49, %v2250_v44  ;;  %v1269_v3 = vrot.slane %v1243_v6, %v2245_v42  ;;  %v1273_v15 = vrot.slane %v1244_v49, %v2245_v42 }
 0x1c3   : > { %v1376_v16 = vpop.permute.xlu1 %1375  ;;  %v1285_v62 = vrot.slane %v1243_v6, %v2268_v53  ;;  %v1289_v38 = vrot.slane %v1244_v49, %v2268_v53  ;;  %v1301_v2 = vrot.slane %v1243_v6, %v2273_v57  ;;  %v1305_v9 = vrot.slane %v1244_v49, %v2273_v57 }
 0x1c4   : > { %v1258_v24 = vmul.f32 %v1253_v39, %v2572_v31  ;;  %v1259_v17 = vmul.f32 %v1257_v59, %v2572_v31  ;;  %v1274_v29 = vmul.f32 %v1269_v3, %v2578_v19  ;;  %v1275_v26 = vmul.f32 %v1273_v15, %v2578_v19  ;;  %v1378_v19 = vpop.permute.xlu0 %1377 }
 0x1c5   : > { %v1338_v31 = vrot.slane %v2505_v13, %v2245_v42  ;;  %v1290_v12 = vmul.f32 %v1285_v62, %v2588_v43  ;;  %v1291_v58 = vmul.f32 %v1289_v38, %v2588_v43  ;;  %v1306_v50 = vmul.f32 %v1301_v2, %v2586_v5 }
 0x1c6   : > { %v1260_v10 = vadd.f32 %v1258_v24, %v1235_v7  ;;  %v1261_v23 = vadd.f32 %v1259_v17, %v1236_v32  ;;  %v1307_v21 = vmul.f32 %v1305_v9, %v2586_v5  ;;  %v1379_v22 = vsel %vm703_vm11, %v1376_v16, %v1378_v19 }
 0x1c7   : > { %v1418_v36 = vpop.permute.xlu1 %1417  ;;  %v1380_v56 = vsel %vm703_vm11, %v1378_v19, %v1376_v16  ;;  %v1323_v43 = vmul.f32 %v1318_v45, %v2590_v46  ;;  %v1354_v5 = vrot.slane %v2505_v13, %v2268_v53  ;;  %v1381_v63 = vsel %vm2291_vm6, %v1379_v22, 0.0 }
 0x1c8   : > { %v1276_v1 = vadd.f32 %v1274_v29, %v1260_v10  ;;  %v1277_v34 = vadd.f32 %v1275_v26, %v1261_v23  ;;  %v1382_v0 = vsel %vm2302_vm8, %v1380_v56, 0.0  ;;  %v1339_v6 = vmul.f32 %v1334_v41, %v2592_v25  ;;  %v1434_v32 = vpop.permute.xlu0 %1433 }
 0x1c9   : > { %v1340_v49 = vmul.f32 %v1338_v31, %v2592_v25  ;;  %v1355_v59 = vmul.f32 %v1350_v28, %v2594_v54  ;;  %v1356_v3 = vmul.f32 %v1354_v5, %v2594_v54  ;;  %v1366_v15 = vrot.slane %v2503_v51, %v2273_v57 }
 0x1ca   : > { %v1292_v48 = vadd.f32 %v1290_v12, %v1276_v1  ;;  %v1293_v37 = vadd.f32 %v1291_v58, %v1277_v34  ;;  %v1370_v7 = vrot.slane %v2505_v13, %v2273_v57  ;;  %v1391_v40 = vrot.slane %v1381_v63, %v2250_v44 }
 0x1cb   : > { %v1395_v16 = vrot.slane %v1382_v0, %v2250_v44  ;;  %v1407_v25 = vrot.slane %v1381_v63, %v2245_v42  ;;  %v1411_v62 = vrot.slane %v1382_v0, %v2245_v42  ;;  %v1371_v54 = vmul.f32 %v1366_v15, %v2596_v47 }
 0x1cc   : > { %v1308_v61 = vadd.f32 %v1306_v50, %v1292_v48  ;;  %v1309_v18 = vadd.f32 %v1307_v21, %v1293_v37  ;;  %v1459_v8 = vpop.permute.xlu1 %1458  ;;  %v1372_v2 = vmul.f32 %v1370_v7, %v2596_v47  ;;  %v1423_v13 = vrot.slane %v1381_v63, %v2268_v53  ;;  %v1449_v31 = vpop.permute.xlu0 %1448 }
 0x1cd   : > { %v1427_v10 = vrot.slane %v1382_v0, %v2268_v53  ;;  %v1396_v23 = vmul.f32 %v1391_v40, %v1386_v33  ;;  %v1397_v29 = vmul.f32 %v1395_v16, %v1386_v33  ;;  %v1412_v1 = vmul.f32 %v1407_v25, %v2652_v52 }
 0x1ce   : > { %v1325_v46 = vadd.f32 %v1323_v43, %v1308_v61  ;;  %v1326_v39 = vadd.f32 %v1324_v60, %v1309_v18  ;;  %v1413_v34 = vmul.f32 %v1411_v62, %v2652_v52  ;;  %v1439_v19 = vrot.slane %v1381_v63, %v2273_v57 }
 0x1cf   : > { %v1443_v33 = vrot.slane %v1382_v0, %v2273_v57  ;;  %v1428_v50 = vmul.f32 %v1423_v13, %v1418_v36  ;;  %v1429_v21 = vmul.f32 %v1427_v10, %v1418_v36 }
 0x1d0   : > { %v1341_v24 = vadd.f32 %v1339_v6, %v1325_v46  ;;  %v1342_v17 = vadd.f32 %v1340_v49, %v1326_v39  ;;  %v1444_v61 = vmul.f32 %v1439_v19, %v1434_v32  ;;  %v1491_v40 = vpop.permute.xlu0 %1490 }
 0x1d1   : > { %v1475_v38 = vpop.permute.xlu1 %1474  ;;  %v1445_v18 = vmul.f32 %v1443_v33, %v1434_v32 }
 0x1d2   : > { %v1357_v51 = vadd.f32 %v1355_v59, %v1341_v24  ;;  %v1358_v9 = vadd.f32 %v1356_v3, %v1342_v17 }
 0x1d4   : > { %v1373_v26 = vadd.f32 %v1371_v54, %v1357_v51  ;;  %v1374_v41 = vadd.f32 %v1372_v2, %v1358_v9  ;;  %v1564_v51 = vpop.permute.xlu0 %1563 }
 0x1d5   : > { %v1451_v12 = vpop.permute.xlu1 %1450 }
 0x1d6   : > { %v1398_v58 = vadd.f32 %v1396_v23, %v1373_v26  ;;  %v1399_v45 = vadd.f32 %v1397_v29, %v1374_v41  ;;  %v1452_v47 = vsel %vm2845_vm0, %v1449_v31, %v1451_v12  ;;  %v1453_v11 = vsel %vm2846_vm2, %v1451_v12, %v1449_v31 }
 0x1d7   : > { %v1454_v52 = vsel %vm2217_vm1, %v1452_v47, 0.0  ;;  %v1455_v22 = vsel %vm2437_vm14, %v1453_v11, 0.0  ;;  %vm2847_vm1 = vcmp.lt.s32.totalorder %v2201_v27, 112 }
 0x1d8   : > { %v1414_v48 = vadd.f32 %v1412_v1, %v1398_v58  ;;  %v1415_v37 = vadd.f32 %v1413_v34, %v1399_v45  ;;  %v1464_v28 = vrot.slane %v1454_v52, %v2250_v44  ;;  %v1468_v5 = vrot.slane %v1455_v22, %v2250_v44  ;;  %vm2848_vm3 = vmmov %vm2847_vm1  ;;  %v1548_v11 = vpop.permute.xlu0 %1547 }
 0x1d9   : > { %v1507_v56 = vpop.permute.xlu1 %1506  ;;  %v1480_v35 = vrot.slane %v1454_v52, %v2245_v42  ;;  %v1484_v46 = vrot.slane %v1455_v22, %v2245_v42  ;;  %v1496_v7 = vrot.slane %v1454_v52, %v2268_v53  ;;  %v1500_v32 = vrot.slane %v1455_v22, %v2268_v53 }
 0x1da   : > { %v1430_v43 = vadd.f32 %v1428_v50, %v1414_v48  ;;  %v1431_v60 = vadd.f32 %v1429_v21, %v1415_v37  ;;  %v1469_v6 = vmul.f32 %v1464_v28, %v1459_v8  ;;  %v1470_v49 = vmul.f32 %v1468_v5, %v1459_v8 }
 0x1db   : > { %v1485_v3 = vmul.f32 %v1480_v35, %v1475_v38  ;;  %v1486_v15 = vmul.f32 %v1484_v46, %v1475_v38  ;;  %v1512_v17 = vrot.slane %v1454_v52, %v2273_v57  ;;  %v1516_v8 = vrot.slane %v1455_v22, %v2273_v57 }
 0x1dc   : > { %v1446_v63 = vadd.f32 %v1444_v61, %v1430_v43  ;;  %v1447_v0 = vadd.f32 %v1445_v18, %v1431_v60  ;;  %v1501_v62 = vmul.f32 %v1496_v7, %v1491_v40  ;;  %v1502_v54 = vmul.f32 %v1500_v32, %v1491_v40  ;;  %v1621_v35 = vpop.permute.xlu0 %1620 }
 0x1dd   : > { %v1517_v41 = vmul.f32 %v1512_v17, %v1507_v56  ;;  %v1518_v31 = vmul.f32 %v1516_v8, %v1507_v56 }
 0x1de   : > { %v1532_v36 = vpop.permute.xlu1 %1531  ;;  %v1471_v55 = vadd.f32 %v1469_v6, %v1446_v63  ;;  %v1472_v39 = vadd.f32 %v1470_v49, %v1447_v0 }
 0x1e0   : > { %v1487_v16 = vadd.f32 %v1485_v3, %v1471_v55  ;;  %v1488_v24 = vadd.f32 %v1486_v15, %v1472_v39  ;;  %v1637_v17 = vpop.permute.xlu0 %1636 }
 0x1e2   : > { %v1522_v59 = vpop.permute.xlu1 %1521  ;;  %v1503_v10 = vadd.f32 %v1501_v62, %v1487_v16  ;;  %v1504_v23 = vadd.f32 %v1502_v54, %v1488_v24 }
 0x1e4   : > { %v1519_v12 = vadd.f32 %v1517_v41, %v1503_v10  ;;  %v1520_v58 = vadd.f32 %v1518_v31, %v1504_v23  ;;  %v1903_v31 = vld [vmem:[%s2069_s11] sm:$0xff]  ;;  %s1684_s11 = scalar_lea.sflag [#allocation3], %s215_s9 }
 0x1e6   : > { %v1524_v25 = vpop.permute.xlu1 %1523 }
 0x1e7   : > { %v1525_v2 = vsel %vm2847_vm1, %v1522_v59, %v1524_v25  ;;  %v1526_v38 = vsel %vm2848_vm3, %v1524_v25, %v1522_v59 }
 0x1e8   : > { %v1528_v9 = vsel %vm231_vm12, %v1526_v38, 0.0  ;;  %v1537_v13 = vrot.slane %v1525_v2, %v2250_v44  ;;  %v1553_v45 = vrot.slane %v1525_v2, %v2245_v42  ;;  %v1569_v50 = vrot.slane %v1525_v2, %v2268_v53 }
 0x1e9   : > { %v1541_v29 = vrot.slane %v1528_v9, %v2250_v44  ;;  %v1557_v47 = vrot.slane %v1528_v9, %v2245_v42  ;;  %v1573_v21 = vrot.slane %v1528_v9, %v2268_v53  ;;  %v1585_v43 = vrot.slane %v1525_v2, %v2273_v57 }
 0x1ea   : > { %v1580_v26 = vpop.permute.xlu1 %1579  ;;  %v1542_v1 = vmul.f32 %v1537_v13, %v1532_v36  ;;  %v1558_v48 = vmul.f32 %v1553_v45, %v1548_v11  ;;  %v1589_v60 = vrot.slane %v1528_v9, %v2273_v57  ;;  %v1574_v61 = vmul.f32 %v1569_v50, %v1564_v51 }
 0x1eb   : > { %v1543_v34 = vmul.f32 %v1541_v29, %v1532_v36  ;;  %v1559_v37 = vmul.f32 %v1557_v47, %v1548_v11  ;;  %v1575_v18 = vmul.f32 %v1573_v21, %v1564_v51  ;;  %v1590_v6 = vmul.f32 %v1585_v43, %v1580_v26 }
 0x1ec   : > { %v1544_v30 = vadd.f32 %v1542_v1, %v1519_v12  ;;  %v1591_v49 = vmul.f32 %v1589_v60, %v1580_v26 }
 0x1ed   : > { %v1545_v19 = vadd.f32 %v1543_v34, %v1520_v58 }
 0x1ee   : > { %v1560_v52 = vadd.f32 %v1558_v48, %v1544_v30 }
 0x1ef   : > { %v1605_v33 = vpop.permute.xlu1 %1604  ;;  %v1561_v22 = vadd.f32 %v1559_v37, %v1545_v19 }
 0x1f0   : > { %v1576_v28 = vadd.f32 %v1574_v61, %v1560_v52 }
 0x1f1   : > { %v1577_v5 = vadd.f32 %v1575_v18, %v1561_v22 }
 0x1f2   : > { %v1592_v7 = vadd.f32 %v1590_v6, %v1576_v28 }
 0x1f3   : > { %v1595_v56 = vpop.permute.xlu1 %1594  ;;  %v1593_v27 = vadd.f32 %v1591_v49, %v1577_v5 }
 0x1f7   : > { %v1597_v63 = vpop.permute.xlu1 %1596 }
 0x1f8   : > { %v1598_v0 = vsel %vm937_vm15, %v1595_v56, %v1597_v63  ;;  %v1599_v36 = vsel %vm937_vm15, %v1597_v63, %v1595_v56 }
 0x1f9   : > { %v1600_v46 = vsel %vm2291_vm6, %v1598_v0, 0.0  ;;  %v1601_v55 = vsel %vm2483_vm13, %v1599_v36, 0.0 }
 0x1fa   : > { %v1610_v39 = vrot.slane %v1600_v46, %v2250_v44  ;;  %v1614_v59 = vrot.slane %v1601_v55, %v2250_v44  ;;  %v1626_v3 = vrot.slane %v1600_v46, %v2245_v42  ;;  %v1630_v15 = vrot.slane %v1601_v55, %v2245_v42 }
 0x1fb   : > { %v1642_v16 = vrot.slane %v1600_v46, %v2268_v53  ;;  %v1646_v20 = vrot.slane %v1601_v55, %v2268_v53  ;;  %v1658_v14 = vrot.slane %v1600_v46, %v2273_v57  ;;  %v1662_v24 = vrot.slane %v1601_v55, %v2273_v57  ;;  %v1653_v54 = vpop.permute.xlu1 %1652 }
 0x1fc   : > { %v1615_v32 = vmul.f32 %v1610_v39, %v1605_v33  ;;  %v1616_v40 = vmul.f32 %v1614_v59, %v1605_v33  ;;  %v1631_v25 = vmul.f32 %v1626_v3, %v1621_v35  ;;  %v1632_v62 = vmul.f32 %v1630_v15, %v1621_v35 }
 0x1fd   : > { %v1647_v38 = vmul.f32 %v1642_v16, %v1637_v17  ;;  %v1648_v51 = vmul.f32 %v1646_v20, %v1637_v17  ;;  %v1663_v9 = vmul.f32 %v1658_v14, %v1653_v54  ;;  %v1664_v13 = vmul.f32 %v1662_v24, %v1653_v54 }
 0x1fe   : > { %v1617_v8 = vadd.f32 %v1615_v32, %v1592_v7  ;;  %v1618_v44 = vadd.f32 %v1616_v40, %v1593_v27 }
 0x200   : > { %v1633_v42 = vadd.f32 %v1631_v25, %v1617_v8  ;;  %v1634_v2 = vadd.f32 %v1632_v62, %v1618_v44  ;;  %v1670_v23 = vpop.permute.xlu1 %1669 }
 0x202   : > { %v1649_v53 = vadd.f32 %v1647_v38, %v1633_v42  ;;  %v1650_v10 = vadd.f32 %v1648_v51, %v1634_v2 }
 0x204   : > { %v1665_v57 = vadd.f32 %v1663_v9, %v1649_v53  ;;  %v1666_v29 = vadd.f32 %v1664_v13, %v1650_v10 }
 0x206   : > { %v1672_v26 = vadd.f32 %v1670_v23, %v1665_v57  ;;  %v1673_v41 = vadd.f32 %v1670_v23, %v1666_v29 }
 0x208   : > { %v1674_v1 = vadd.f32 %v1903_v31, %v1672_v26  ;;  %v1675_v34 = vadd.f32 %v1673_v41, %v2079_v4 }
 0x20a   : > { %v1676_v12 = vmax.f32 %v1674_v1, 0.0  ;;  %v1677_v58 = vmax.f32 %v1675_v34, 0.0 }
 0x20c   : > { %v1680_v45 = vcombine.low %v1676_v12, %v1677_v58 }
 0x20e   : > { %1682 = vst [vmem:[%s217_s17] sm:$0xff] %v1680_v45 }
 0x20f   : > { %1917 = shalt.err (!%p1914_p3)
}
 0x210   : > { %s1918_s7 = scalar_lea.hbm %s2777_s12, 128  ;;  %s1922_s23 = scalar_lea.hbm %s2824_s5, 256 }
 0x211   : > { %p1919_p4 = scmp.ne.s32.totalorder %s2777_s12, %s1918_s7  ;;  %p1923_p9 = scmp.lt.u32.totalorder %s2777_s12, %s2824_s5 }
 0x212   : > { %p1924_p10 = scmp.lt.u32.totalorder %s1922_s23, %s1918_s7  ;;  %p1926_p12 = scmp.lt.u32.totalorder %s1918_s7, %s2777_s12 }
 0x213   : > { %p1920_p7 = pnand %p1919_p4, %p2049_p5 }
 0x214   : > { %p1925_p11 = por %p1924_p10, %p1923_p9 }
 0x215   : > { %p1921_p8 = pneg %p1920_p7 }
 0x216   : > { %p1927_p13 = por %p1926_p12, %p1925_p11 }
 0x218   : > { %p1928_p0 = pnand %p1927_p13, %p1921_p8 }
 0x21a   : > { %1931 = shalt.err (!%p1928_p0)
}
 0x21b   : > { %1787 = dma.vmem_to_hbm [thread:$0]  (%p2049_p5), %s2779_s25, 128, %s2777_s12, %s1684_s11  }
 0x21c PF: > { %p1793_p1 = scmp.ge.s32.totalorder %s1966_s21, 2  ;;  %s1710_s15 = sand.u32 1, %s1954_s18  }
 0x21d   : > { %s1711_s17 = scalar_lea.sflag [#allocation3], %s1710_s15 }
 0x21e   : > { %p1790_p2 = pnand %p1793_p1, %p2053_p6 }
 0x220   : > { %1949 = dma.done.wait (!%p1790_p2), %s1711_s17, 128  }
 0x221   : > { %1951 = vsyncadd (!%p1790_p2), %s1711_s17, 4294967168  ;;  %p15_p3 = scmp.ge.s32.totalorder %s2036_s24, 4   ;;  %s2849_s18 = smov %s1958_s19 }
 0x222   : > { %s2850_s19 = smov %s1962_s20  ;;  %s2851_s20 = smov %s2047_s27 }
 0x223   : > { %s2852_s21 = smov %s2036_s24  ;;  %17 = sbr.rel (!%p15_p3) target bundleno = 3 (0x3), region = 91 }
 0x22a   :  { %1716 = vsyncpa [#allocation3], 1 }
 0x22b   :  { %1718 = vsyncpa [#allocation3 + $0x1], 1 }

</bundles_post_ra>
